<compile_context>
chip_gen: v7x
topology: tpu7x:2x2x1
jax: 0.10.0
libtpu: 0.0.40
codegen_flags: <defaults>
</compile_context>

<pallas_src>
import functools

import jax
import jax.numpy as jnp
from jax import lax
from jax.experimental import pallas as pl
from jax.experimental.pallas import tpu as pltpu


# ----------------------------- fused kernel -----------------------------

def _cda_kernel(r_ref, s_ref,
                lnR_w_ref, lnR_b_ref, lnS_w_ref, lnS_b_ref,
                w_kv_ref, b_kv_ref, w_q_ref, b_q_ref,
                w_proj_ref, b_proj_ref, temp_row_ref, attn_bias_ref,
                o_ref, *, num_heads):
    f32 = jnp.float32
    bf16 = jnp.bfloat16

    Bt, M, D = r_ref.shape

    def layernorm(x, w, b):
        # WithBias_LayerNorm: mean / biased variance over last dim, eps = 1e-5
        mu = jnp.mean(x, axis=-1, keepdims=True)
        xc = x - mu
        var = jnp.mean(xc * xc, axis=-1, keepdims=True)
        return xc * lax.rsqrt(var + 1e-5) * w + b

    # ---- LayerNorms + 1x1 convs on the packed (Bt*M, D) slab ----
    x_r = r_ref[...].reshape(Bt * M, D).astype(f32)
    x_s = s_ref[...].reshape(Bt * M, D).astype(f32)
    norm_R = layernorm(x_r, lnR_w_ref[...], lnR_b_ref[...])          # (Bt*M, D)
    norm_S = layernorm(x_s, lnS_w_ref[...], lnS_b_ref[...])          # (Bt*M, D)

    # 1x1 Conv1d == channels-last matmul (bf16 MXU operands, f32 accumulate)
    kv = jnp.dot(norm_R.astype(bf16), w_kv_ref[...],
                 preferred_element_type=f32) + b_kv_ref[...]         # (Bt*M, 2D)
    q2 = jnp.dot(norm_S.astype(bf16), w_q_ref[...],
                 preferred_element_type=f32) + b_q_ref[...]          # (Bt*M, D)

    # ---- per-batch channel attention ----
    q3 = q2.reshape(Bt, M, D)
    k3 = kv[:, :D].reshape(Bt, M, D)
    v3 = kv[:, D:].reshape(Bt, M, D)

    # F.normalize(dim=-1) in PyTorch channels-first layout == per-column
    # (over M) normalization here; eps=1e-12 on the norm -> clamp ssq at 1e-24.
    # Head-independent, so computed once on the full (M, D) tensors.
    qn = q3 * lax.rsqrt(jnp.maximum(
        jnp.sum(q3 * q3, axis=1, keepdims=True), 1e-24))
    kn = k3 * lax.rsqrt(jnp.maximum(
        jnp.sum(k3 * k3, axis=1, keepdims=True), 1e-24))

    # attn[b, ci, cj] = sum_m qn[b, m, ci] * kn[b, m, cj]   (contract over M)
    attn = lax.dot_general(qn.astype(bf16), kn.astype(bf16),
                           (((1,), (1,)), ((0,), (0,))),
                           preferred_element_type=f32)               # (Bt, D, D)

    # temperature (per-channel row) + block-diagonal head mask (additive -1e30)
    attn = attn * temp_row_ref[...] + attn_bias_ref[...]
    attn = attn - jnp.max(attn, axis=-1, keepdims=True)
    e = jnp.exp(attn)
    p = e * pl.reciprocal(jnp.sum(e, axis=-1, keepdims=True), approx=True)

    # out[b, m, ci] = sum_cj v[b, m, cj] * p[b, ci, cj]  (p kept in f32; cheap)
    out = lax.dot_general(v3, p, (((2,), (2,)), ((0,), (0,))),
                          preferred_element_type=f32)                # (Bt, M, D)

    # project_out (Conv1d 1x1); channels-last output already matches the final
    # .permute(0, 2, 1) of the PyTorch module.
    out2 = jnp.dot(out.reshape(Bt * M, D).astype(bf16), w_proj_ref[...],
                   preferred_element_type=f32) + b_proj_ref[...]     # (Bt*M, D)
    o_ref[...] = out2.reshape(Bt, M, D).astype(o_ref.dtype)


# ----------------------------- wrapper -----------------------------

def _full_spec(shape):
    n = len(shape)
    return pl.BlockSpec(shape, lambda i, _n=n: (0,) * _n)


def _pick_block_b(B, min_steps=8):
    # Largest divisor of B that still leaves at least min(B, min_steps) grid
    # steps, so BlockSpec double-buffering can overlap DMA with compute and
    # v7x's two TensorCores each get several iterations.
    target = min(B, min_steps)
    best = 1
    for bb in range(1, B + 1):
        if B % bb == 0 and B // bb >= target:
            best = bb
    return best


def cda_forward(input_R, input_S, params, num_heads, block_b=None):
    B, M, D = input_R.shape
    assert input_S.shape == (B, M, D)
    assert D % num_heads == 0
    H = num_heads
    c = D // H
    f32 = jnp.float32
    bf16 = jnp.bfloat16

    if block_b is None:
        block_b = _pick_block_b(B)
    assert B % block_b == 0
    n_steps = B // block_b

    def row(v):
        return jnp.asarray(v, f32).reshape(1, -1)

    # Weights stored (in, out) == transpose of PyTorch Conv1d weight; cast the
    # matmul weights to bf16 once at trace time.
    w_kv = params['w_kv'].astype(bf16)        # (D, 2D)
    w_q = params['w_q'].astype(bf16)          # (D, D)
    w_proj = params['w_proj'].astype(bf16)    # (D, D)

    # Per-channel temperature row (each head's temperature repeated c times).
    temp_row = jnp.repeat(jnp.asarray(params['temperature'], f32).reshape(-1),
                          c).reshape(1, D)
    # Block-diagonal additive mask: 0 within a head's (c, c) block, -1e30 off.
    head_id = jnp.arange(D, dtype=jnp.int32) // c
    attn_bias = jnp.where(head_id[:, None] == head_id[None, :],
                          0.0, -1e30).astype(f32)                    # (D, D)

    batch_spec = pl.BlockSpec((block_b, M, D), lambda i: (i, 0, 0))
    kernel = functools.partial(_cda_kernel, num_heads=H)

    in_bytes = jnp.dtype(input_R.dtype).itemsize
    cost = pl.CostEstimate(
        flops=int(12 * B * M * D * D + 10 * B * M * D),
        transcendentals=int(B * D * D + 2 * B * M + 3 * B * D),
        bytes_accessed=int(2 * B * M * D * in_bytes + B * M * D * 4
                           + 4 * D * D * 2 + D * D * 4 + 16 * D),
    )

    return pl.pallas_call(
        kernel,
        out_shape=jax.ShapeDtypeStruct((B, M, D), f32),
        grid=(n_steps,),
        in_specs=[
            batch_spec,                 # input_R  (block_b batches per step)
            batch_spec,                 # input_S
            _full_spec((1, D)), _full_spec((1, D)),            # R LayerNorm w, b
            _full_spec((1, D)), _full_spec((1, D)),            # S LayerNorm w, b
            _full_spec((D, 2 * D)), _full_spec((1, 2 * D)),    # kv conv
            _full_spec((D, D)), _full_spec((1, D)),            # q conv
            _full_spec((D, D)), _full_spec((1, D)),            # project_out
            _full_spec((1, D)),                                # temperature row
            _full_spec((D, D)),                                # head-block mask
        ],
        out_specs=batch_spec,
        compiler_params=pltpu.CompilerParams(
            dimension_semantics=("parallel",)),
        cost_estimate=cost,
    )(input_R, input_S,
      row(params['lnR_w']), row(params['lnR_b']),
      row(params['lnS_w']), row(params['lnS_b']),
      w_kv, row(params['b_kv']),
      w_q, row(params['b_q']),
      w_proj, row(params['b_proj']),
      temp_row, attn_bias)


# ----------------------------- pure-JAX reference -----------------------------

def cda_reference(input_R, input_S, params, num_heads):
    f32 = jnp.float32
    x_r = input_R.astype(f32)
    x_s = input_S.astype(f32)

    def ln(x, w, b):
        mu = jnp.mean(x, -1, keepdims=True)
        var = jnp.mean((x - mu) ** 2, -1, keepdims=True)
        return (x - mu) / jnp.sqrt(var + 1e-5) * w + b

    nR = ln(x_r, params['lnR_w'], params['lnR_b'])
    nS = ln(x_s, params['lnS_w'], params['lnS_b'])
    kv = nR @ params['w_kv'].astype(f32) + params['b_kv']
    q = nS @ params['w_q'].astype(f32) + params['b_q']
    B, M, D = q.shape
    H = num_heads
    c = D // H
    k, v = kv[..., :D], kv[..., D:]

    def split(t):                                      # (B, M, D) -> (B, H, M, c)
        return t.reshape(B, M, H, c).transpose(0, 2, 1, 3)

    qh, kh, vh = split(q), split(k), split(v)

    def nrm(t):                                        # F.normalize over M axis
        n = jnp.sqrt(jnp.sum(t * t, axis=2, keepdims=True))
        return t / jnp.maximum(n, 1e-12)

    qh, kh = nrm(qh), nrm(kh)
    temp = jnp.asarray(params['temperature'], f32).reshape(1, H, 1, 1)
    attn = jnp.einsum('bhmc,bhmd->bhcd', qh, kh) * temp
    attn = jax.nn.softmax(attn, axis=-1)
    out = jnp.einsum('bhcd,bhmd->bhmc', attn, vh)      # (B, H, M, c)
    out = out.transpose(0, 2, 1, 3).reshape(B, M, D)
    out = out @ params['w_proj'].astype(f32) + params['b_proj']
    return out


# ----------------------------- main -----------------------------

if __name__ == "__main__":
    B, M, DIM, HEADS = 16, 64, 32, 2

    key = jax.random.PRNGKey(0)
    ks = jax.random.split(key, 8)

    def rnd(k, shape):
        return (0.1 * jax.random.normal(k, shape)).astype(jnp.float32)

    params = {
        # LayerNorms (PyTorch init: weight=1, bias=0)
        'lnR_w': jnp.ones((DIM,), jnp.float32), 'lnR_b': jnp.zeros((DIM,), jnp.float32),
        'lnS_w': jnp.ones((DIM,), jnp.float32), 'lnS_b': jnp.zeros((DIM,), jnp.float32),
        # CDA_Attention
        'temperature': jnp.ones((HEADS, 1, 1), jnp.float32),
        'w_kv': rnd(ks[0], (DIM, 2 * DIM)), 'b_kv': rnd(ks[1], (2 * DIM,)),
        'w_q': rnd(ks[2], (DIM, DIM)),      'b_q': rnd(ks[3], (DIM,)),
        'w_proj': rnd(ks[4], (DIM, DIM)),   'b_proj': rnd(ks[5], (DIM,)),
    }

    input_R = rnd(ks[6], (B, M, DIM))     # (B, M, dim)
    input_S = rnd(ks[7], (B, M, DIM))     # (B, M, dim)

    out = cda_forward(input_R, input_S, params, num_heads=HEADS)
    out = jax.block_until_ready(out)
    assert out.shape == (B, M, DIM)
    assert bool(jnp.all(jnp.isfinite(out)))

    ref = cda_reference(input_R, input_S, params, HEADS)
    assert bool(jnp.allclose(out, ref, atol=5e-2, rtol=5e-2))

    print("KERNEL_OK")
</pallas_src>

<mosaic_0001>
module attributes {stable_mosaic.version = 11 : i64} {
  func.func @_cda_kernel(%arg0: i32, %arg1: memref<2x64x32xf32, #tpu.memory_space<vmem>>, %arg2: memref<2x64x32xf32, #tpu.memory_space<vmem>>, %arg3: memref<1x32xf32, #tpu.memory_space<vmem>>, %arg4: memref<1x32xf32, #tpu.memory_space<vmem>>, %arg5: memref<1x32xf32, #tpu.memory_space<vmem>>, %arg6: memref<1x32xf32, #tpu.memory_space<vmem>>, %arg7: memref<32x64xbf16, #tpu.memory_space<vmem>>, %arg8: memref<1x64xf32, #tpu.memory_space<vmem>>, %arg9: memref<32x32xbf16, #tpu.memory_space<vmem>>, %arg10: memref<1x32xf32, #tpu.memory_space<vmem>>, %arg11: memref<32x32xbf16, #tpu.memory_space<vmem>>, %arg12: memref<1x32xf32, #tpu.memory_space<vmem>>, %arg13: memref<1x32xf32, #tpu.memory_space<vmem>>, %arg14: memref<32x32xf32, #tpu.memory_space<vmem>>, %arg15: memref<2x64x32xf32, #tpu.memory_space<vmem>>) attributes {dimension_semantics = [#tpu.dimension_semantics<parallel>], iteration_bounds = array<i64: 8>, scalar_prefetch = 0 : i64, scratch_operands = 0 : i64, tpu.core_type = #tpu.core_type<tc>, window_params = [{transform_indices = @transform_0, window_bounds = array<i64: 2, 64, 32>}, {transform_indices = @transform_1, window_bounds = array<i64: 2, 64, 32>}, {pipeline_mode = #tpu.pipeline_mode<synchronous>, transform_indices = @transform_2, window_bounds = array<i64: 1, 32>}, {pipeline_mode = #tpu.pipeline_mode<synchronous>, transform_indices = @transform_3, window_bounds = array<i64: 1, 32>}, {pipeline_mode = #tpu.pipeline_mode<synchronous>, transform_indices = @transform_4, window_bounds = array<i64: 1, 32>}, {pipeline_mode = #tpu.pipeline_mode<synchronous>, transform_indices = @transform_5, window_bounds = array<i64: 1, 32>}, {pipeline_mode = #tpu.pipeline_mode<synchronous>, transform_indices = @transform_6, window_bounds = array<i64: 32, 64>}, {pipeline_mode = #tpu.pipeline_mode<synchronous>, transform_indices = @transform_7, window_bounds = array<i64: 1, 64>}, {pipeline_mode = #tpu.pipeline_mode<synchronous>, transform_indices = @transform_8, window_bounds = array<i64: 32, 32>}, {pipeline_mode = #tpu.pipeline_mode<synchronous>, transform_indices = @transform_9, window_bounds = array<i64: 1, 32>}, {pipeline_mode = #tpu.pipeline_mode<synchronous>, transform_indices = @transform_10, window_bounds = array<i64: 32, 32>}, {pipeline_mode = #tpu.pipeline_mode<synchronous>, transform_indices = @transform_11, window_bounds = array<i64: 1, 32>}, {pipeline_mode = #tpu.pipeline_mode<synchronous>, transform_indices = @transform_12, window_bounds = array<i64: 1, 32>}, {pipeline_mode = #tpu.pipeline_mode<synchronous>, transform_indices = @transform_13, window_bounds = array<i64: 32, 32>}, {transform_indices = @transform_14, window_bounds = array<i64: 2, 64, 32>}]} {
    %c0 = arith.constant 0 : index
    %c0_0 = arith.constant 0 : index
    %c0_1 = arith.constant 0 : index
    %0 = vector.load %arg1[%c0, %c0_0, %c0_1] : memref<2x64x32xf32, #tpu.memory_space<vmem>>, vector<2x64x32xf32>
    %1 = vector.shape_cast %0 : vector<2x64x32xf32> to vector<128x32xf32>
    %c0_2 = arith.constant 0 : index
    %c0_3 = arith.constant 0 : index
    %c0_4 = arith.constant 0 : index
    %2 = vector.load %arg2[%c0_2, %c0_3, %c0_4] : memref<2x64x32xf32, #tpu.memory_space<vmem>>, vector<2x64x32xf32>
    %3 = vector.shape_cast %2 : vector<2x64x32xf32> to vector<128x32xf32>
    %c0_5 = arith.constant 0 : index
    %c0_6 = arith.constant 0 : index
    %4 = vector.load %arg3[%c0_5, %c0_6] : memref<1x32xf32, #tpu.memory_space<vmem>>, vector<1x32xf32>
    %c0_7 = arith.constant 0 : index
    %c0_8 = arith.constant 0 : index
    %5 = vector.load %arg4[%c0_7, %c0_8] : memref<1x32xf32, #tpu.memory_space<vmem>>, vector<1x32xf32>
    %cst = arith.constant dense<0.000000e+00> : vector<128xf32>
    %6 = vector.multi_reduction <add>, %1, %cst [1] : vector<128x32xf32> to vector<128xf32>
    %7 = vector.shape_cast %6 : vector<128xf32> to vector<128x1xf32>
    %cst_9 = arith.constant 3.200000e+01 : f32
    %8 = vector.broadcast %cst_9 : f32 to vector<128x1xf32>
    %9 = arith.divf %7, %8 : vector<128x1xf32>
    %10 = vector.broadcast %9 : vector<128x1xf32> to vector<128x32xf32>
    %11 = arith.subf %1, %10 : vector<128x32xf32>
    %12 = arith.mulf %11, %11 : vector<128x32xf32>
    %cst_10 = arith.constant dense<0.000000e+00> : vector<128xf32>
    %13 = vector.multi_reduction <add>, %12, %cst_10 [1] : vector<128x32xf32> to vector<128xf32>
    %14 = vector.shape_cast %13 : vector<128xf32> to vector<128x1xf32>
    %cst_11 = arith.constant 3.200000e+01 : f32
    %15 = vector.broadcast %cst_11 : f32 to vector<128x1xf32>
    %16 = arith.divf %14, %15 : vector<128x1xf32>
    %cst_12 = arith.constant 9.99999974E-6 : f32
    %17 = vector.broadcast %cst_12 : f32 to vector<128x1xf32>
    %18 = arith.addf %16, %17 : vector<128x1xf32>
    %19 = math.rsqrt %18 : vector<128x1xf32>
    %20 = vector.broadcast %19 : vector<128x1xf32> to vector<128x32xf32>
    %21 = arith.mulf %11, %20 : vector<128x32xf32>
    %22 = vector.broadcast %4 : vector<1x32xf32> to vector<128x32xf32>
    %23 = arith.mulf %21, %22 : vector<128x32xf32>
    %24 = vector.broadcast %5 : vector<1x32xf32> to vector<128x32xf32>
    %25 = arith.addf %23, %24 : vector<128x32xf32>
    %c0_13 = arith.constant 0 : index
    %c0_14 = arith.constant 0 : index
    %26 = vector.load %arg5[%c0_13, %c0_14] : memref<1x32xf32, #tpu.memory_space<vmem>>, vector<1x32xf32>
    %c0_15 = arith.constant 0 : index
    %c0_16 = arith.constant 0 : index
    %27 = vector.load %arg6[%c0_15, %c0_16] : memref<1x32xf32, #tpu.memory_space<vmem>>, vector<1x32xf32>
    %cst_17 = arith.constant dense<0.000000e+00> : vector<128xf32>
    %28 = vector.multi_reduction <add>, %3, %cst_17 [1] : vector<128x32xf32> to vector<128xf32>
    %29 = vector.shape_cast %28 : vector<128xf32> to vector<128x1xf32>
    %cst_18 = arith.constant 3.200000e+01 : f32
    %30 = vector.broadcast %cst_18 : f32 to vector<128x1xf32>
    %31 = arith.divf %29, %30 : vector<128x1xf32>
    %32 = vector.broadcast %31 : vector<128x1xf32> to vector<128x32xf32>
    %33 = arith.subf %3, %32 : vector<128x32xf32>
    %34 = arith.mulf %33, %33 : vector<128x32xf32>
    %cst_19 = arith.constant dense<0.000000e+00> : vector<128xf32>
    %35 = vector.multi_reduction <add>, %34, %cst_19 [1] : vector<128x32xf32> to vector<128xf32>
    %36 = vector.shape_cast %35 : vector<128xf32> to vector<128x1xf32>
    %cst_20 = arith.constant 3.200000e+01 : f32
    %37 = vector.broadcast %cst_20 : f32 to vector<128x1xf32>
    %38 = arith.divf %36, %37 : vector<128x1xf32>
    %cst_21 = arith.constant 9.99999974E-6 : f32
    %39 = vector.broadcast %cst_21 : f32 to vector<128x1xf32>
    %40 = arith.addf %38, %39 : vector<128x1xf32>
    %41 = math.rsqrt %40 : vector<128x1xf32>
    %42 = vector.broadcast %41 : vector<128x1xf32> to vector<128x32xf32>
    %43 = arith.mulf %33, %42 : vector<128x32xf32>
    %44 = vector.broadcast %26 : vector<1x32xf32> to vector<128x32xf32>
    %45 = arith.mulf %43, %44 : vector<128x32xf32>
    %46 = vector.broadcast %27 : vector<1x32xf32> to vector<128x32xf32>
    %47 = arith.addf %45, %46 : vector<128x32xf32>
    %48 = arith.truncf %25 : vector<128x32xf32> to vector<128x32xbf16>
    %c0_22 = arith.constant 0 : index
    %c0_23 = arith.constant 0 : index
    %49 = vector.load %arg7[%c0_22, %c0_23] : memref<32x64xbf16, #tpu.memory_space<vmem>>, vector<32x64xbf16>
    %cst_24 = arith.constant dense<0.000000e+00> : vector<128x64xf32>
    %50 = tpu.matmul %48, %49, %cst_24 {dimension_numbers = #tpu.dot_dimension_numbers<[1], [0], [0], [1], [0, 0, 1, 1], [], []>} : vector<128x32xbf16>, vector<32x64xbf16>, vector<128x64xf32> -> vector<128x64xf32>
    %c0_25 = arith.constant 0 : index
    %c0_26 = arith.constant 0 : index
    %51 = vector.load %arg8[%c0_25, %c0_26] : memref<1x64xf32, #tpu.memory_space<vmem>>, vector<1x64xf32>
    %52 = vector.broadcast %51 : vector<1x64xf32> to vector<128x64xf32>
    %53 = arith.addf %50, %52 : vector<128x64xf32>
    %54 = arith.truncf %47 : vector<128x32xf32> to vector<128x32xbf16>
    %c0_27 = arith.constant 0 : index
    %c0_28 = arith.constant 0 : index
    %55 = vector.load %arg9[%c0_27, %c0_28] : memref<32x32xbf16, #tpu.memory_space<vmem>>, vector<32x32xbf16>
    %cst_29 = arith.constant dense<0.000000e+00> : vector<128x32xf32>
    %56 = tpu.matmul %54, %55, %cst_29 {dimension_numbers = #tpu.dot_dimension_numbers<[1], [0], [0], [1], [0, 0, 1, 1], [], []>} : vector<128x32xbf16>, vector<32x32xbf16>, vector<128x32xf32> -> vector<128x32xf32>
    %c0_30 = arith.constant 0 : index
    %c0_31 = arith.constant 0 : index
    %57 = vector.load %arg10[%c0_30, %c0_31] : memref<1x32xf32, #tpu.memory_space<vmem>>, vector<1x32xf32>
    %58 = vector.broadcast %57 : vector<1x32xf32> to vector<128x32xf32>
    %59 = arith.addf %56, %58 : vector<128x32xf32>
    %60 = vector.shape_cast %59 : vector<128x32xf32> to vector<2x64x32xf32>
    %61 = vector.extract_strided_slice %53 {offsets = [0, 0], sizes = [128, 32], strides = [1, 1]} : vector<128x64xf32> to vector<128x32xf32>
    %62 = vector.shape_cast %61 : vector<128x32xf32> to vector<2x64x32xf32>
    %63 = vector.extract_strided_slice %53 {offsets = [0, 32], sizes = [128, 32], strides = [1, 1]} : vector<128x64xf32> to vector<128x32xf32>
    %64 = vector.shape_cast %63 : vector<128x32xf32> to vector<2x64x32xf32>
    %65 = arith.mulf %60, %60 : vector<2x64x32xf32>
    %cst_32 = arith.constant dense<0.000000e+00> : vector<2x32xf32>
    %66 = vector.multi_reduction <add>, %65, %cst_32 [1] : vector<2x64x32xf32> to vector<2x32xf32>
    %67 = vector.shape_cast %66 : vector<2x32xf32> to vector<2x1x32xf32>
    %cst_33 = arith.constant 1.000000e-24 : f32
    %68 = vector.broadcast %cst_33 : f32 to vector<2x1x32xf32>
    %69 = arith.maximumf %67, %68 : vector<2x1x32xf32>
    %70 = math.rsqrt %69 : vector<2x1x32xf32>
    %71 = vector.broadcast %70 : vector<2x1x32xf32> to vector<2x64x32xf32>
    %72 = arith.mulf %60, %71 : vector<2x64x32xf32>
    %73 = arith.mulf %62, %62 : vector<2x64x32xf32>
    %cst_34 = arith.constant dense<0.000000e+00> : vector<2x32xf32>
    %74 = vector.multi_reduction <add>, %73, %cst_34 [1] : vector<2x64x32xf32> to vector<2x32xf32>
    %75 = vector.shape_cast %74 : vector<2x32xf32> to vector<2x1x32xf32>
    %cst_35 = arith.constant 1.000000e-24 : f32
    %76 = vector.broadcast %cst_35 : f32 to vector<2x1x32xf32>
    %77 = arith.maximumf %75, %76 : vector<2x1x32xf32>
    %78 = math.rsqrt %77 : vector<2x1x32xf32>
    %79 = vector.broadcast %78 : vector<2x1x32xf32> to vector<2x64x32xf32>
    %80 = arith.mulf %62, %79 : vector<2x64x32xf32>
    %81 = arith.truncf %72 : vector<2x64x32xf32> to vector<2x64x32xbf16>
    %82 = arith.truncf %80 : vector<2x64x32xf32> to vector<2x64x32xbf16>
    %cst_36 = arith.constant dense<0.000000e+00> : vector<2x32x32xf32>
    %83 = tpu.matmul %81, %82, %cst_36 {dimension_numbers = #tpu.dot_dimension_numbers<[1], [1], [2], [2], [0, 0, 0, 2, 1, 2], [0], [0]>} : vector<2x64x32xbf16>, vector<2x64x32xbf16>, vector<2x32x32xf32> -> vector<2x32x32xf32>
    %c0_37 = arith.constant 0 : index
    %c0_38 = arith.constant 0 : index
    %84 = vector.load %arg13[%c0_37, %c0_38] : memref<1x32xf32, #tpu.memory_space<vmem>>, vector<1x32xf32>
    %85 = vector.shape_cast %84 : vector<1x32xf32> to vector<1x1x32xf32>
    %86 = vector.broadcast %85 : vector<1x1x32xf32> to vector<2x32x32xf32>
    %87 = arith.mulf %83, %86 : vector<2x32x32xf32>
    %c0_39 = arith.constant 0 : index
    %c0_40 = arith.constant 0 : index
    %88 = vector.load %arg14[%c0_39, %c0_40] : memref<32x32xf32, #tpu.memory_space<vmem>>, vector<32x32xf32>
    %89 = vector.shape_cast %88 : vector<32x32xf32> to vector<1x32x32xf32>
    %90 = vector.broadcast %89 : vector<1x32x32xf32> to vector<2x32x32xf32>
    %91 = arith.addf %87, %90 : vector<2x32x32xf32>
    %cst_41 = arith.constant dense<0xFF800000> : vector<2x32xf32>
    %92 = vector.multi_reduction <maximumf>, %91, %cst_41 [2] : vector<2x32x32xf32> to vector<2x32xf32>
    %93 = vector.shape_cast %92 : vector<2x32xf32> to vector<2x32x1xf32>
    %94 = vector.broadcast %93 : vector<2x32x1xf32> to vector<2x32x32xf32>
    %95 = arith.subf %91, %94 : vector<2x32x32xf32>
    %96 = math.exp %95 : vector<2x32x32xf32>
    %cst_42 = arith.constant dense<0.000000e+00> : vector<2x32xf32>
    %97 = vector.multi_reduction <add>, %96, %cst_42 [2] : vector<2x32x32xf32> to vector<2x32xf32>
    %98 = vector.shape_cast %97 : vector<2x32xf32> to vector<2x32x1xf32>
    %99 = tpu.reciprocal %98 {approx = true} : vector<2x32x1xf32> -> vector<2x32x1xf32>
    %100 = vector.broadcast %99 : vector<2x32x1xf32> to vector<2x32x32xf32>
    %101 = arith.mulf %96, %100 : vector<2x32x32xf32>
    %cst_43 = arith.constant dense<0.000000e+00> : vector<2x64x32xf32>
    %102 = tpu.matmul %64, %101, %cst_43 {dimension_numbers = #tpu.dot_dimension_numbers<[2], [2], [1], [1], [0, 0, 0, 1, 1, 1], [0], [0]>} : vector<2x64x32xf32>, vector<2x32x32xf32>, vector<2x64x32xf32> -> vector<2x64x32xf32>
    %103 = vector.shape_cast %102 : vector<2x64x32xf32> to vector<128x32xf32>
    %104 = arith.truncf %103 : vector<128x32xf32> to vector<128x32xbf16>
    %c0_44 = arith.constant 0 : index
    %c0_45 = arith.constant 0 : index
    %105 = vector.load %arg11[%c0_44, %c0_45] : memref<32x32xbf16, #tpu.memory_space<vmem>>, vector<32x32xbf16>
    %cst_46 = arith.constant dense<0.000000e+00> : vector<128x32xf32>
    %106 = tpu.matmul %104, %105, %cst_46 {dimension_numbers = #tpu.dot_dimension_numbers<[1], [0], [0], [1], [0, 0, 1, 1], [], []>} : vector<128x32xbf16>, vector<32x32xbf16>, vector<128x32xf32> -> vector<128x32xf32>
    %c0_47 = arith.constant 0 : index
    %c0_48 = arith.constant 0 : index
    %107 = vector.load %arg12[%c0_47, %c0_48] : memref<1x32xf32, #tpu.memory_space<vmem>>, vector<1x32xf32>
    %108 = vector.broadcast %107 : vector<1x32xf32> to vector<128x32xf32>
    %109 = arith.addf %106, %108 : vector<128x32xf32>
    %110 = vector.shape_cast %109 : vector<128x32xf32> to vector<2x64x32xf32>
    %c0_49 = arith.constant 0 : index
    %c0_50 = arith.constant 0 : index
    %c0_51 = arith.constant 0 : index
    %111 = vector.load %arg15[%c0_49, %c0_50, %c0_51] : memref<2x64x32xf32, #tpu.memory_space<vmem>>, vector<2x64x32xf32>
    tpu.vector_store %arg15[%c0_49, %c0_50, %c0_51], %110 {strides = array<i32>} : memref<2x64x32xf32, #tpu.memory_space<vmem>>, vector<2x64x32xf32>,
    return
  }
  func.func @transform_0(%arg0: i32) -> (i32, i32, i32) {
    %c0_i32 = arith.constant 0 : i32
    %c0_i32_0 = arith.constant 0 : i32
    %c0_i32_1 = arith.constant 0 : i32
    return %arg0, %c0_i32, %c0_i32_0 : i32, i32, i32
  }
  func.func @transform_1(%arg0: i32) -> (i32, i32, i32) {
    %c0_i32 = arith.constant 0 : i32
    %c0_i32_0 = arith.constant 0 : i32
    %c0_i32_1 = arith.constant 0 : i32
    return %arg0, %c0_i32, %c0_i32_0 : i32, i32, i32
  }
  func.func @transform_2(%arg0: i32) -> (i32, i32) {
    %c0_i32 = arith.constant 0 : i32
    %c0_i32_0 = arith.constant 0 : i32
    %c0_i32_1 = arith.constant 0 : i32
    return %c0_i32, %c0_i32_0 : i32, i32
  }
  func.func @transform_3(%arg0: i32) -> (i32, i32) {
    %c0_i32 = arith.constant 0 : i32
    %c0_i32_0 = arith.constant 0 : i32
    %c0_i32_1 = arith.constant 0 : i32
    return %c0_i32, %c0_i32_0 : i32, i32
  }
  func.func @transform_4(%arg0: i32) -> (i32, i32) {
    %c0_i32 = arith.constant 0 : i32
    %c0_i32_0 = arith.constant 0 : i32
    %c0_i32_1 = arith.constant 0 : i32
    return %c0_i32, %c0_i32_0 : i32, i32
  }
  func.func @transform_5(%arg0: i32) -> (i32, i32) {
    %c0_i32 = arith.constant 0 : i32
    %c0_i32_0 = arith.constant 0 : i32
    %c0_i32_1 = arith.constant 0 : i32
    return %c0_i32, %c0_i32_0 : i32, i32
  }
  func.func @transform_6(%arg0: i32) -> (i32, i32) {
    %c0_i32 = arith.constant 0 : i32
    %c0_i32_0 = arith.constant 0 : i32
    %c0_i32_1 = arith.constant 0 : i32
    return %c0_i32, %c0_i32_0 : i32, i32
  }
  func.func @transform_7(%arg0: i32) -> (i32, i32) {
    %c0_i32 = arith.constant 0 : i32
    %c0_i32_0 = arith.constant 0 : i32
    %c0_i32_1 = arith.constant 0 : i32
    return %c0_i32, %c0_i32_0 : i32, i32
  }
  func.func @transform_8(%arg0: i32) -> (i32, i32) {
    %c0_i32 = arith.constant 0 : i32
    %c0_i32_0 = arith.constant 0 : i32
    %c0_i32_1 = arith.constant 0 : i32
    return %c0_i32, %c0_i32_0 : i32, i32
  }
  func.func @transform_9(%arg0: i32) -> (i32, i32) {
    %c0_i32 = arith.constant 0 : i32
    %c0_i32_0 = arith.constant 0 : i32
    %c0_i32_1 = arith.constant 0 : i32
    return %c0_i32, %c0_i32_0 : i32, i32
  }
  func.func @transform_10(%arg0: i32) -> (i32, i32) {
    %c0_i32 = arith.constant 0 : i32
    %c0_i32_0 = arith.constant 0 : i32
    %c0_i32_1 = arith.constant 0 : i32
    return %c0_i32, %c0_i32_0 : i32, i32
  }
  func.func @transform_11(%arg0: i32) -> (i32, i32) {
    %c0_i32 = arith.constant 0 : i32
    %c0_i32_0 = arith.constant 0 : i32
    %c0_i32_1 = arith.constant 0 : i32
    return %c0_i32, %c0_i32_0 : i32, i32
  }
  func.func @transform_12(%arg0: i32) -> (i32, i32) {
    %c0_i32 = arith.constant 0 : i32
    %c0_i32_0 = arith.constant 0 : i32
    %c0_i32_1 = arith.constant 0 : i32
    return %c0_i32, %c0_i32_0 : i32, i32
  }
  func.func @transform_13(%arg0: i32) -> (i32, i32) {
    %c0_i32 = arith.constant 0 : i32
    %c0_i32_0 = arith.constant 0 : i32
    %c0_i32_1 = arith.constant 0 : i32
    return %c0_i32, %c0_i32_0 : i32, i32
  }
  func.func @transform_14(%arg0: i32) -> (i32, i32, i32) {
    %c0_i32 = arith.constant 0 : i32
    %c0_i32_0 = arith.constant 0 : i32
    %c0_i32_1 = arith.constant 0 : i32
    return %arg0, %c0_i32, %c0_i32_0 : i32, i32, i32
  }
}

</mosaic_0001>

<bundles_post_ra>
// kernel: tpu_custom_call.1
= control target key start
LH: loop header
LB: loop body
LE: loop exit
PB: predicated region body
PF: predicated region fallthrough
CT: control target
= control target key end

     0   :  { %s2837_s29 = smov 0   ;;  %s3764_s0 = inlined_call_operand.vmem [shape: f32[16,64,32], index: 0, kind: input, shape index: {}]   ;;  %s3765_s1 = inlined_call_operand.vmem [shape: f32[16,64,32], index: 1, kind: input, shape index: {}]   ;;  %s3766_s2 = inlined_call_operand.vmem [shape: f32[1,32], index: 2, kind: input, shape index: {}]   ;;  %s3767_s3 = inlined_call_operand.vmem [shape: f32[1,32], index: 3, kind: input, shape index: {}]   ;;  %s3768_s4 = inlined_call_operand.vmem [shape: f32[1,32], index: 4, kind: input, shape index: {}]   ;;  %s3769_s5 = inlined_call_operand.vmem [shape: f32[1,32], index: 5, kind: input, shape index: {}]   ;;  %s3770_s6 = inlined_call_operand.vmem [shape: bf16[32,64], index: 6, kind: input, shape index: {}]   ;;  %s3771_s7 = inlined_call_operand.vmem [shape: f32[1,64], index: 7, kind: input, shape index: {}]   ;;  %s3772_s8 = inlined_call_operand.vmem [shape: bf16[32,32], index: 8, kind: input, shape index: {}]   ;;  %s3773_s9 = inlined_call_operand.vmem [shape: f32[1,32], index: 9, kind: input, shape index: {}]   ;;  %s3774_s10 = inlined_call_operand.vmem [shape: bf16[32,32], index: 10, kind: input, shape index: {}]   ;;  %s3775_s11 = inlined_call_operand.vmem [shape: f32[1,32], index: 11, kind: input, shape index: {}]   ;;  %s3776_s12 = inlined_call_operand.vmem [shape: f32[1,32], index: 12, kind: input, shape index: {}]   ;;  %s3777_s13 = inlined_call_operand.vmem [shape: f32[32,32], index: 13, kind: input, shape index: {}]   ;;  %s3778_s14 = inlined_call_operand.vmem [shape: f32[16,64,32], index: 14, kind: output, shape index: {}]  }
   0x1 LB: > { %s2330_s30 = sadd.s32 4294967295, %s2759_s29   ;;  %p2334_p0 = scmp.ge.s32.totalorder %s2759_s29, 1  ;;  %s2759_s29 = sphi %s2837_s29, %s24_s29  }
   0x2   : > { %p426_p1 = scmp.lt.s32.totalorder %s2759_s29, 9 }
   0x4   : > { %p427_p2 = pnand %p2334_p0, %p426_p1 }
   0x5   : > { %s2335_s15 = sshll.u32 (!%p427_p2), %s2330_s30, 1  ;;  %vm536_vm0 = vcmask (!%p427_p2), 261120   ;;  %vm1536_vm1 = vcmask (!%p427_p2), 523264   ;;  %s2761_s25 = smov (!%p427_p2), 96  }
   0x6   : > { %430 = sbr.rel (%p427_p2) target bundleno = 1791 (0x6ff), region = 76  ;;  %p481_p3 = scmp.lt.s32.totalorder (!%p427_p2), %s2335_s15, 15  ;;  %vm3665_vm2 = vmpackc.low (!%p427_p2), %vm536_vm0, %vm536_vm0 }
   0xd   : > { %s3782_s15 = smov (!%p481_p3, %s2335_s15), 15 }
   0xe   : > { %s2845_s16 = sshll.u32 %s3782_s15, 6 }
   0xf   : > { %s2851_s19 = scalar_lea.vmem %s3764_s0, %s2845_s16  ;;  %s2893_s22 = scalar_lea.vmem %s3765_s1, %s2845_s16 }
  0x10   : > { %v2854_v0 = vld [vmem:[%s2851_s19 + $0x40] sm:$0xff]  ;;  %v2857_v1 = vld [vmem:[%s2851_s19 + $0x50] sm:$0xff]  ;;  %v2860_v2 = vld [vmem:[%s2851_s19 + $0x48] sm:$0xff]  ;;  %s3727_s20 = scalar_lea.vmem %s3778_s14, %s2845_s16 }
  0x11   : > { %v561_v3 = vsel %vm536_vm0, %v2854_v0, 0.0  ;;  %v567_v4 = vsel %vm536_vm0, %v2857_v1, 0.0  ;;  %v2867_v5 = vld [vmem:[%s2851_s19 + $0x58] sm:$0xff]  ;;  %v564_v6 = vsel %vm536_vm0, %v2860_v2, 0.0  ;;  %v2874_v8 = vld [vmem:[%s2851_s19 + $0x60] sm:$0xff]  ;;  %v2877_v9 = vld [vmem:[%s2851_s19 + $0x68] sm:$0xff] }
  0x12   : > { %562 = vadd.xlane.f32.xlu0 %v561_v3  ;;  %568 = vadd.xlane.f32.xlu1 %v567_v4  ;;  %v570_v7 = vsel %vm536_vm0, %v2867_v5, 0.0  ;;  %v573_v10 = vsel %vm536_vm0, %v2874_v8, 0.0  ;;  %v576_v11 = vsel %vm536_vm0, %v2877_v9, 0.0  ;;  %v2884_v12 = vld [vmem:[%s2851_s19 + $0x70] sm:$0xff]  ;;  %v2887_v13 = vld [vmem:[%s2851_s19 + $0x78] sm:$0xff]  ;;  %v2900_v16 = vld [vmem:[%s2893_s22] sm:$0xff] }
  0x13   : > { %v579_v14 = vsel %vm536_vm0, %v2884_v12, 0.0  ;;  %v582_v15 = vsel %vm536_vm0, %v2887_v13, 0.0  ;;  %v2903_v17 = vld [vmem:[%s2893_s22 + $0x8] sm:$0xff]  ;;  %v792_v18 = vsel %vm536_vm0, %v2900_v16, 0.0  ;;  %v2910_v20 = vld [vmem:[%s2893_s22 + $0x10] sm:$0xff]  ;;  %v2913_v21 = vld [vmem:[%s2893_s22 + $0x18] sm:$0xff] }
  0x14   : > { %v795_v19 = vsel %vm536_vm0, %v2903_v17, 0.0  ;;  %v798_v22 = vsel %vm536_vm0, %v2910_v20, 0.0  ;;  %v801_v23 = vsel %vm536_vm0, %v2913_v21, 0.0  ;;  %v2920_v24 = vld [vmem:[%s2893_s22 + $0x20] sm:$0xff]  ;;  %v2923_v25 = vld [vmem:[%s2893_s22 + $0x28] sm:$0xff]  ;;  %v2930_v28 = vld [vmem:[%s2893_s22 + $0x30] sm:$0xff] }
  0x15   : > { %v804_v26 = vsel %vm536_vm0, %v2920_v24, 0.0  ;;  %v807_v27 = vsel %vm536_vm0, %v2923_v25, 0.0  ;;  %v2933_v29 = vld [vmem:[%s2893_s22 + $0x38] sm:$0xff]  ;;  %v810_v30 = vsel %vm536_vm0, %v2930_v28, 0.0  ;;  %v2940_v32 = vld [vmem:[%s2893_s22 + $0x40] sm:$0xff]  ;;  %v2943_v33 = vld [vmem:[%s2893_s22 + $0x48] sm:$0xff] }
  0x16   : > { %565 = vadd.xlane.f32.xlu0 %v564_v6  ;;  %571 = vadd.xlane.f32.xlu1 %v570_v7  ;;  %v813_v31 = vsel %vm536_vm0, %v2933_v29, 0.0  ;;  %v816_v34 = vsel %vm536_vm0, %v2940_v32, 0.0  ;;  %v819_v35 = vsel %vm536_vm0, %v2943_v33, 0.0  ;;  %v2950_v36 = vld [vmem:[%s2893_s22 + $0x50] sm:$0xff]  ;;  %v2953_v37 = vld [vmem:[%s2893_s22 + $0x58] sm:$0xff]  ;;  %v2960_v40 = vld [vmem:[%s2893_s22 + $0x60] sm:$0xff] }
  0x17   : > { %v822_v38 = vsel %vm536_vm0, %v2950_v36, 0.0  ;;  %v825_v39 = vsel %vm536_vm0, %v2953_v37, 0.0  ;;  %v2963_v41 = vld [vmem:[%s2893_s22 + $0x68] sm:$0xff]  ;;  %v828_v42 = vsel %vm536_vm0, %v2960_v40, 0.0  ;;  %v2970_v44 = vld [vmem:[%s2893_s22 + $0x70] sm:$0xff]  ;;  %v2973_v45 = vld [vmem:[%s2893_s22 + $0x78] sm:$0xff] }
  0x18   : > { %v831_v43 = vsel %vm536_vm0, %v2963_v41, 0.0  ;;  %v834_v46 = vsel %vm536_vm0, %v2970_v44, 0.0  ;;  %v837_v47 = vsel %vm536_vm0, %v2973_v45, 0.0  ;;  %v2980_v48 = vld [vmem:[%s2851_s19] sm:$0xff]  ;;  %v2983_v49 = vld [vmem:[%s2851_s19 + $0x8] sm:$0xff]  ;;  %v2990_v52 = vld [vmem:[%s2851_s19 + $0x10] sm:$0xff] }
  0x19   : > { %v537_v50 = vsel %vm536_vm0, %v2980_v48, 0.0  ;;  %v540_v51 = vsel %vm536_vm0, %v2983_v49, 0.0  ;;  %v2993_v53 = vld [vmem:[%s2851_s19 + $0x18] sm:$0xff]  ;;  %v543_v54 = vsel %vm536_vm0, %v2990_v52, 0.0  ;;  %v3000_v56 = vld [vmem:[%s2851_s19 + $0x20] sm:$0xff]  ;;  %v3003_v57 = vld [vmem:[%s2851_s19 + $0x28] sm:$0xff] }
  0x1a   : > { %574 = vadd.xlane.f32.xlu0 %v573_v10  ;;  %577 = vadd.xlane.f32.xlu1 %v576_v11  ;;  %v546_v55 = vsel %vm536_vm0, %v2993_v53, 0.0  ;;  %v549_v58 = vsel %vm536_vm0, %v3000_v56, 0.0  ;;  %v552_v59 = vsel %vm536_vm0, %v3003_v57, 0.0  ;;  %v3010_v60 = vld [vmem:[%s2851_s19 + $0x30] sm:$0xff]  ;;  %v3013_v61 = vld [vmem:[%s2851_s19 + $0x38] sm:$0xff] }
  0x1b   : > { %v555_v62 = vsel %vm536_vm0, %v3010_v60, 0.0  ;;  %v558_v63 = vsel %vm536_vm0, %v3013_v61, 0.0 }
  0x1e   : > { %580 = vadd.xlane.f32.xlu0 %v579_v14  ;;  %583 = vadd.xlane.f32.xlu1 %v582_v15 }
  0x22   : > { %793 = vadd.xlane.f32.xlu0 %v792_v18  ;;  %796 = vadd.xlane.f32.xlu1 %v795_v19 }
  0x26   : > { %799 = vadd.xlane.f32.xlu0 %v798_v22  ;;  %802 = vadd.xlane.f32.xlu1 %v801_v23 }
  0x2a   : > { %805 = vadd.xlane.f32.xlu0 %v804_v26  ;;  %808 = vadd.xlane.f32.xlu1 %v807_v27 }
  0x2e   : > { %811 = vadd.xlane.f32.xlu0 %v810_v30  ;;  %814 = vadd.xlane.f32.xlu1 %v813_v31 }
  0x32   : > { %817 = vadd.xlane.f32.xlu0 %v816_v34  ;;  %820 = vadd.xlane.f32.xlu1 %v819_v35 }
  0x36   : > { %823 = vadd.xlane.f32.xlu0 %v822_v38  ;;  %826 = vadd.xlane.f32.xlu1 %v825_v39 }
  0x3a   : > { %829 = vadd.xlane.f32.xlu0 %v828_v42  ;;  %832 = vadd.xlane.f32.xlu1 %v831_v43 }
  0x3e   : > { %835 = vadd.xlane.f32.xlu0 %v834_v46  ;;  %838 = vadd.xlane.f32.xlu1 %v837_v47 }
  0x42   : > { %538 = vadd.xlane.f32.xlu0 %v537_v50  ;;  %541 = vadd.xlane.f32.xlu1 %v540_v51 }
  0x46   : > { %544 = vadd.xlane.f32.xlu0 %v543_v54  ;;  %547 = vadd.xlane.f32.xlu1 %v546_v55 }
  0x4a   : > { %550 = vadd.xlane.f32.xlu0 %v549_v58  ;;  %553 = vadd.xlane.f32.xlu1 %v552_v59 }
  0x4e   : > { %556 = vadd.xlane.f32.xlu0 %v555_v62  ;;  %559 = vadd.xlane.f32.xlu1 %v558_v63 }
  0x9f   : > { %v563_v3 = vpop.xlane.xlu0 %562  ;;  %v569_v4 = vpop.xlane.xlu1 %568 }
  0xa0   : > { %v594_v6 = vmul.f32 0.03125, %v563_v3  ;;  %v596_v7 = vmul.f32 0.03125, %v569_v4 }
  0xa2   : > { %v3020_v10 = vsub.f32 %v2854_v0, %v594_v6  ;;  %v3023_v11 = vsub.f32 %v2857_v1, %v596_v7 }
  0xa3   : > { %v566_v14 = vpop.xlane.xlu0 %565  ;;  %v572_v15 = vpop.xlane.xlu1 %571 }
  0xa4   : > { %v595_v18 = vmul.f32 0.03125, %v566_v14  ;;  %v597_v19 = vmul.f32 0.03125, %v572_v15  ;;  %v626_v22 = vmul.f32 %v3020_v10, %v3020_v10  ;;  %v628_v23 = vmul.f32 %v3023_v11, %v3023_v11 }
  0xa6   : > { %v3030_v26 = vsub.f32 %v2860_v2, %v595_v18  ;;  %v3033_v27 = vsub.f32 %v2867_v5, %v597_v19  ;;  %v658_v0 = vsel %vm536_vm0, %v626_v22, 0.0  ;;  %v664_v31 = vsel %vm536_vm0, %v628_v23, 0.0 }
  0xa7   : > { %v575_v1 = vpop.xlane.xlu0 %574  ;;  %659 = vadd.xlane.f32.xlu0 %v658_v0  ;;  %v578_v30 = vpop.xlane.xlu1 %577 }
  0xa8   : > { %v598_v34 = vmul.f32 0.03125, %v575_v1  ;;  %v599_v35 = vmul.f32 0.03125, %v578_v30  ;;  %v627_v38 = vmul.f32 %v3030_v26, %v3030_v26  ;;  %v629_v39 = vmul.f32 %v3033_v27, %v3033_v27 }
  0xaa   : > { %v3042_v2 = vsub.f32 %v2874_v8, %v598_v34  ;;  %v3045_v5 = vsub.f32 %v2877_v9, %v599_v35  ;;  %v661_v42 = vsel %vm536_vm0, %v627_v38, 0.0  ;;  %v667_v47 = vsel %vm536_vm0, %v629_v39, 0.0 }
  0xab   : > { %v581_v43 = vpop.xlane.xlu0 %580  ;;  %662 = vadd.xlane.f32.xlu1 %v661_v42  ;;  %665 = vadd.xlane.f32.xlu0 %v664_v31  ;;  %v584_v46 = vpop.xlane.xlu1 %583 }
  0xac   : > { %v600_v50 = vmul.f32 0.03125, %v581_v43  ;;  %v601_v51 = vmul.f32 0.03125, %v584_v46  ;;  %v630_v54 = vmul.f32 %v3042_v2, %v3042_v2  ;;  %v631_v8 = vmul.f32 %v3045_v5, %v3045_v5 }
  0xae   : > { %v3054_v55 = vsub.f32 %v2884_v12, %v600_v50  ;;  %v3057_v9 = vsub.f32 %v2887_v13, %v601_v51  ;;  %v670_v58 = vsel %vm536_vm0, %v630_v54, 0.0  ;;  %v673_v63 = vsel %vm536_vm0, %v631_v8, 0.0 }
  0xaf   : > { %v794_v59 = vpop.xlane.xlu0 %793  ;;  %668 = vadd.xlane.f32.xlu1 %v667_v47  ;;  %671 = vadd.xlane.f32.xlu0 %v670_v58  ;;  %v797_v62 = vpop.xlane.xlu1 %796 }
  0xb0   : > { %v840_v3 = vmul.f32 0.03125, %v794_v59  ;;  %v841_v4 = vmul.f32 0.03125, %v797_v62  ;;  %v632_v6 = vmul.f32 %v3054_v55, %v3054_v55  ;;  %v633_v12 = vmul.f32 %v3057_v9, %v3057_v9 }
  0xb2   : > { %v3066_v7 = vsub.f32 %v2900_v16, %v840_v3  ;;  %v3069_v13 = vsub.f32 %v2903_v17, %v841_v4  ;;  %v676_v14 = vsel %vm536_vm0, %v632_v6, 0.0  ;;  %v679_v19 = vsel %vm536_vm0, %v633_v12, 0.0 }
  0xb3   : > { %v800_v15 = vpop.xlane.xlu0 %799  ;;  %674 = vadd.xlane.f32.xlu1 %v673_v63  ;;  %677 = vadd.xlane.f32.xlu0 %v676_v14  ;;  %v803_v18 = vpop.xlane.xlu1 %802 }
  0xb4   : > { %v842_v22 = vmul.f32 0.03125, %v800_v15  ;;  %v843_v23 = vmul.f32 0.03125, %v803_v18  ;;  %v872_v0 = vmul.f32 %v3066_v7, %v3066_v7  ;;  %v873_v16 = vmul.f32 %v3069_v13, %v3069_v13 }
  0xb6   : > { %v3078_v1 = vsub.f32 %v2910_v20, %v842_v22  ;;  %v3081_v17 = vsub.f32 %v2913_v21, %v843_v23  ;;  %v888_v30 = vsel %vm536_vm0, %v872_v0, 0.0  ;;  %v891_v35 = vsel %vm536_vm0, %v873_v16, 0.0 }
  0xb7   : > { %v806_v31 = vpop.xlane.xlu0 %805  ;;  %680 = vadd.xlane.f32.xlu1 %v679_v19  ;;  %889 = vadd.xlane.f32.xlu0 %v888_v30  ;;  %v809_v34 = vpop.xlane.xlu1 %808 }
  0xb8   : > { %v844_v38 = vmul.f32 0.03125, %v806_v31  ;;  %v845_v39 = vmul.f32 0.03125, %v809_v34  ;;  %v874_v42 = vmul.f32 %v3078_v1, %v3078_v1  ;;  %v875_v20 = vmul.f32 %v3081_v17, %v3081_v17 }
  0xba   : > { %v3090_v43 = vsub.f32 %v2920_v24, %v844_v38  ;;  %v3093_v21 = vsub.f32 %v2923_v25, %v845_v39  ;;  %v894_v46 = vsel %vm536_vm0, %v874_v42, 0.0  ;;  %v897_v51 = vsel %vm536_vm0, %v875_v20, 0.0 }
  0xbb   : > { %v812_v47 = vpop.xlane.xlu0 %811  ;;  %892 = vadd.xlane.f32.xlu1 %v891_v35  ;;  %895 = vadd.xlane.f32.xlu0 %v894_v46  ;;  %v815_v50 = vpop.xlane.xlu1 %814 }
  0xbc   : > { %v846_v54 = vmul.f32 0.03125, %v812_v47  ;;  %v847_v8 = vmul.f32 0.03125, %v815_v50  ;;  %v876_v58 = vmul.f32 %v3090_v43, %v3090_v43  ;;  %v877_v24 = vmul.f32 %v3093_v21, %v3093_v21 }
  0xbe   : > { %v3102_v59 = vsub.f32 %v2930_v28, %v846_v54  ;;  %v3105_v25 = vsub.f32 %v2933_v29, %v847_v8  ;;  %v900_v62 = vsel %vm536_vm0, %v876_v58, 0.0  ;;  %v903_v4 = vsel %vm536_vm0, %v877_v24, 0.0  ;;  %v2643_v58 = vld [vmem:[%s3770_s6] sm:$0xff]  }
  0xbf   : > { %v818_v63 = vpop.xlane.xlu0 %817  ;;  %898 = vadd.xlane.f32.xlu1 %v897_v51  ;;  %901 = vadd.xlane.f32.xlu0 %v900_v62  ;;  %v821_v3 = vpop.xlane.xlu1 %820 }
  0xc0   : > { %v848_v6 = vmul.f32 0.03125, %v818_v63  ;;  %v849_v12 = vmul.f32 0.03125, %v821_v3  ;;  %v878_v14 = vmul.f32 %v3102_v59, %v3102_v59  ;;  %v879_v28 = vmul.f32 %v3105_v25, %v3105_v25  ;;  %2629 = vmatprep.subr.bf16.mxu1 %v2643_v58  ;;  %2481 = vmatprep.subr.bf16.mxu0 %v2643_v58 }
  0xc1   : > { %2631 = vmatpush3.bf16.msra.mxu1 %v2643_v58  ;;  %2482 = vmatpush3.bf16.msra.mxu0 %v2643_v58 }
  0xc2   : > { %v3114_v15 = vsub.f32 %v2940_v32, %v848_v6  ;;  %v3117_v29 = vsub.f32 %v2943_v33, %v849_v12  ;;  %v906_v18 = vsel %vm536_vm0, %v878_v14, 0.0  ;;  %v909_v23 = vsel %vm536_vm0, %v879_v28, 0.0  ;;  %v2644_v28 = vld [vmem:[%s3770_s6 + $0x8] sm:$0xff]  }
  0xc3   : > { %v824_v19 = vpop.xlane.xlu0 %823  ;;  %904 = vadd.xlane.f32.xlu1 %v903_v4  ;;  %907 = vadd.xlane.f32.xlu0 %v906_v18  ;;  %v827_v22 = vpop.xlane.xlu1 %826 }
  0xc4   : > { %v850_v0 = vmul.f32 0.03125, %v824_v19  ;;  %v851_v16 = vmul.f32 0.03125, %v827_v22  ;;  %v880_v30 = vmul.f32 %v3114_v15, %v3114_v15  ;;  %v881_v32 = vmul.f32 %v3117_v29, %v3117_v29  ;;  %2630 = vmatprep.subr.bf16.mxu1 %v2644_v28  ;;  %2483 = vmatprep.subr.bf16.mxu0 %v2644_v28 }
  0xc5   : > { %2632 = vmatpush3.bf16.msra.mxu1 %v2644_v28  ;;  %2484 = vmatpush3.bf16.msra.mxu0 %v2644_v28 }
  0xc6   : > { %v3126_v31 = vsub.f32 %v2950_v36, %v850_v0  ;;  %v3129_v33 = vsub.f32 %v2953_v37, %v851_v16  ;;  %v912_v34 = vsel %vm536_vm0, %v880_v30, 0.0  ;;  %v915_v39 = vsel %vm536_vm0, %v881_v32, 0.0 }
  0xc7   : > { %v830_v35 = vpop.xlane.xlu0 %829  ;;  %910 = vadd.xlane.f32.xlu1 %v909_v23  ;;  %913 = vadd.xlane.f32.xlu0 %v912_v34  ;;  %v833_v38 = vpop.xlane.xlu1 %832 }
  0xc8   : > { %v852_v42 = vmul.f32 0.03125, %v830_v35  ;;  %v853_v20 = vmul.f32 0.03125, %v833_v38  ;;  %v882_v46 = vmul.f32 %v3126_v31, %v3126_v31  ;;  %v883_v36 = vmul.f32 %v3129_v33, %v3129_v33 }
  0xca   : > { %v3138_v47 = vsub.f32 %v2960_v40, %v852_v42  ;;  %v3141_v37 = vsub.f32 %v2963_v41, %v853_v20  ;;  %v918_v50 = vsel %vm536_vm0, %v882_v46, 0.0  ;;  %v921_v8 = vsel %vm536_vm0, %v883_v36, 0.0 }
  0xcb   : > { %v836_v51 = vpop.xlane.xlu0 %835  ;;  %916 = vadd.xlane.f32.xlu1 %v915_v39  ;;  %919 = vadd.xlane.f32.xlu0 %v918_v50  ;;  %v839_v54 = vpop.xlane.xlu1 %838 }
  0xcc   : > { %v854_v24 = vmul.f32 0.03125, %v836_v51  ;;  %v855_v62 = vmul.f32 0.03125, %v839_v54  ;;  %v884_v40 = vmul.f32 %v3138_v47, %v3138_v47  ;;  %v885_v41 = vmul.f32 %v3141_v37, %v3141_v37 }
  0xce   : > { %v3153_v63 = vsub.f32 %v2970_v44, %v854_v24  ;;  %v3156_v3 = vsub.f32 %v2973_v45, %v855_v62  ;;  %v924_v4 = vsel %vm536_vm0, %v884_v40, 0.0  ;;  %v927_v12 = vsel %vm536_vm0, %v885_v41, 0.0  ;;  %v3202_v41 = vld [vmem:[%s3772_s8] sm:$0xff]  }
  0xcf   : > { %922 = vadd.xlane.f32.xlu1 %v921_v8  ;;  %925 = vadd.xlane.f32.xlu0 %v924_v4  ;;  %v539_v6 = vpop.xlane.xlu0 %538  ;;  %v542_v14 = vpop.xlane.xlu1 %541 }
  0xd0   : > { %v586_v18 = vmul.f32 0.03125, %v539_v6  ;;  %v587_v44 = vmul.f32 0.03125, %v542_v14  ;;  %v886_v45 = vmul.f32 %v3153_v63, %v3153_v63  ;;  %v887_v19 = vmul.f32 %v3156_v3, %v3156_v3  ;;  %2501 = vmatprep.subr.bf16.mxu1 %v3202_v41 }
  0xd2   : > { %v3168_v22 = vsub.f32 %v2980_v48, %v586_v18  ;;  %v3171_v23 = vsub.f32 %v2983_v49, %v587_v44  ;;  %v930_v0 = vsel %vm536_vm0, %v886_v45, 0.0  ;;  %v933_v30 = vsel %vm536_vm0, %v887_v19, 0.0 }
  0xd3   : > { %928 = vadd.xlane.f32.xlu1 %v927_v12  ;;  %931 = vadd.xlane.f32.xlu0 %v930_v0  ;;  %v545_v16 = vpop.xlane.xlu0 %544  ;;  %v548_v32 = vpop.xlane.xlu1 %547 }
  0xd4   : > { %v588_v34 = vmul.f32 0.03125, %v545_v16  ;;  %v589_v35 = vmul.f32 0.03125, %v548_v32  ;;  %v618_v38 = vmul.f32 %v3168_v22, %v3168_v22  ;;  %v619_v48 = vmul.f32 %v3171_v23, %v3171_v23 }
  0xd6   : > { %v3180_v49 = vsub.f32 %v2990_v52, %v588_v34  ;;  %v3183_v39 = vsub.f32 %v2993_v53, %v589_v35  ;;  %v634_v42 = vsel %vm536_vm0, %v618_v38, 0.0  ;;  %v637_v46 = vsel %vm536_vm0, %v619_v48, 0.0 }
  0xd7   : > { %934 = vadd.xlane.f32.xlu1 %v933_v30  ;;  %635 = vadd.xlane.f32.xlu0 %v634_v42  ;;  %v551_v20 = vpop.xlane.xlu0 %550  ;;  %v554_v36 = vpop.xlane.xlu1 %553 }
  0xd8   : > { %v590_v50 = vmul.f32 0.03125, %v551_v20  ;;  %v591_v51 = vmul.f32 0.03125, %v554_v36  ;;  %v620_v54 = vmul.f32 %v3180_v49, %v3180_v49  ;;  %v621_v52 = vmul.f32 %v3183_v39, %v3183_v39 }
  0xda   : > { %v3192_v8 = vsub.f32 %v3000_v56, %v590_v50  ;;  %v3195_v53 = vsub.f32 %v3003_v57, %v591_v51  ;;  %v640_v58 = vsel %vm536_vm0, %v620_v54, 0.0  ;;  %v643_v62 = vsel %vm536_vm0, %v621_v52, 0.0 }
  0xdb   : > { %638 = vadd.xlane.f32.xlu1 %v637_v46  ;;  %641 = vadd.xlane.f32.xlu0 %v640_v58  ;;  %v557_v24 = vpop.xlane.xlu0 %556  ;;  %v560_v40 = vpop.xlane.xlu1 %559 }
  0xdc   : > { %v592_v4 = vmul.f32 0.03125, %v557_v24  ;;  %v593_v6 = vmul.f32 0.03125, %v560_v40  ;;  %v622_v56 = vmul.f32 %v3192_v8, %v3192_v8  ;;  %v623_v57 = vmul.f32 %v3195_v53, %v3195_v53 }
  0xde   : > { %v3210_v12 = vsub.f32 %v3010_v60, %v592_v4  ;;  %v3213_v14 = vsub.f32 %v3013_v61, %v593_v6  ;;  %v646_v28 = vsel %vm536_vm0, %v622_v56, 0.0  ;;  %v649_v18 = vsel %vm536_vm0, %v623_v57, 0.0 }
  0xdf   : > { %644 = vadd.xlane.f32.xlu1 %v643_v62  ;;  %647 = vadd.xlane.f32.xlu0 %v646_v28 }
  0xe0   : > { %v624_v44 = vmul.f32 %v3210_v12, %v3210_v12  ;;  %v625_v45 = vmul.f32 %v3213_v14, %v3213_v14 }
  0xe2   : > { %v652_v19 = vsel %vm536_vm0, %v624_v44, 0.0  ;;  %v655_v60 = vsel %vm536_vm0, %v625_v45, 0.0  ;;  %v3227_v44 = vld [vmem:[%s3766_s2] ss:$0 sm:$0xff] }
  0xe3   : > { %650 = vadd.xlane.f32.xlu1 %v649_v18  ;;  %653 = vadd.xlane.f32.xlu0 %v652_v19 }
  0xe7   : > { %656 = vadd.xlane.f32.xlu1 %v655_v60 }
 0x134   : > { %v660_v61 = vpop.xlane.xlu0 %659 }
 0x135   : > { %v690_v0 = vmul.f32 0.03125, %v660_v61 }
 0x137   : > { %v706_v16 = vadd.f32 1e-05, %v690_v0 }
 0x138   : > { %v663_v30 = vpop.xlane.xlu1 %662  ;;  %v666_v32 = vpop.xlane.xlu0 %665 }
 0x139   : > { %2649 = vrsqrt.f32 %v706_v16  ;;  %v691_v34 = vmul.f32 0.03125, %v663_v30  ;;  %v692_v35 = vmul.f32 0.03125, %v666_v32 }
 0x13b   : > { %v707_v38 = vadd.f32 1e-05, %v691_v34  ;;  %v708_v48 = vadd.f32 1e-05, %v692_v35 }
 0x13c   : > { %v669_v42 = vpop.xlane.xlu1 %668  ;;  %v672_v20 = vpop.xlane.xlu0 %671 }
 0x13d   : > { %2651 = vrsqrt.f32 %v707_v38  ;;  %v693_v46 = vmul.f32 0.03125, %v669_v42  ;;  %v694_v36 = vmul.f32 0.03125, %v672_v20  ;;  %v3235_v38 = vld [vmem:[%s3767_s3] ss:$0 sm:$0xff] }
 0x13e   : > { %2653 = vrsqrt.f32 %v708_v48 }
 0x13f   : > { %v709_v50 = vadd.f32 1e-05, %v693_v46  ;;  %v710_v51 = vadd.f32 1e-05, %v694_v36 }
 0x140   : > { %v675_v54 = vpop.xlane.xlu1 %674  ;;  %v678_v52 = vpop.xlane.xlu0 %677 }
 0x141   : > { %2655 = vrsqrt.f32 %v709_v50  ;;  %v695_v58 = vmul.f32 0.03125, %v675_v54  ;;  %v696_v24 = vmul.f32 0.03125, %v678_v52 }
 0x142   : > { %2657 = vrsqrt.f32 %v710_v51 }
 0x143   : > { %v2650_v62 = vpop.eup %2649  ;;  %v711_v40 = vadd.f32 1e-05, %v695_v58  ;;  %v712_v4 = vadd.f32 1e-05, %v696_v24 }
 0x144   : > { %v681_v6 = vpop.xlane.xlu1 %680  ;;  %v890_v56 = vpop.xlane.xlu0 %889  ;;  %v738_v57 = vmul.f32 %v2650_v62, %v3020_v10 }
 0x145   : > { %2659 = vrsqrt.f32 %v711_v40  ;;  %v697_v28 = vmul.f32 0.03125, %v681_v6  ;;  %v936_v18 = vmul.f32 0.03125, %v890_v56 }
 0x146   : > { %2661 = vrsqrt.f32 %v712_v4  ;;  %v760_v32 = vmul.f32 %v3227_v44, %v738_v57 }
 0x147   : > { %v2652_v45 = vpop.eup %2651  ;;  %v713_v19 = vadd.f32 1e-05, %v697_v28  ;;  %v952_v60 = vadd.f32 1e-05, %v936_v18 }
 0x148   : > { %v2654_v61 = vpop.eup %2653  ;;  %v893_v0 = vpop.xlane.xlu1 %892  ;;  %v739_v30 = vmul.f32 %v2652_v45, %v3030_v26 }
 0x149   : > { %v896_v16 = vpop.xlane.xlu0 %895  ;;  %v740_v10 = vmul.f32 %v2654_v61, %v3023_v11  ;;  %2663 = vrsqrt.f32 %v713_v19  ;;  %v937_v34 = vmul.f32 0.03125, %v893_v0  ;;  %v782_v11 = vadd.f32 %v3235_v38, %v760_v32 }
 0x14a   : > { %v938_v35 = vmul.f32 0.03125, %v896_v16  ;;  %2665 = vrsqrt.f32 %v952_v60  ;;  %v761_v48 = vmul.f32 %v3227_v44, %v739_v30 }
 0x14b   : > { %v2656_v42 = vpop.eup %2655  ;;  %v953_v20 = vadd.f32 1e-05, %v937_v34  ;;  %v762_v52 = vmul.f32 %v3227_v44, %v740_v10 }
 0x14c   : > { %v954_v46 = vadd.f32 1e-05, %v938_v35  ;;  %v2658_v36 = vpop.eup %2657  ;;  %v741_v26 = vmul.f32 %v2656_v42, %v3033_v27  ;;  %v899_v50 = vpop.xlane.xlu1 %898  ;;  %v783_v54 = vadd.f32 %v3235_v38, %v761_v48 }
 0x14d   : > { %v902_v51 = vpop.xlane.xlu0 %901  ;;  %v742_v58 = vmul.f32 %v2658_v36, %v3042_v2  ;;  %2667 = vrsqrt.f32 %v953_v20  ;;  %v939_v24 = vmul.f32 0.03125, %v899_v50  ;;  %v784_v19 = vadd.f32 %v3235_v38, %v762_v52 }
 0x14e   : > { %v940_v62 = vmul.f32 0.03125, %v902_v51  ;;  %2669 = vrsqrt.f32 %v954_v46  ;;  %v1048_v40 = vpack.c.bf16 %v783_v54, %v782_v11  ;;  %v763_v4 = vmul.f32 %v3227_v44, %v741_v26  ;;  %v3263_v51 = vld [vmem:[%s3768_s4] ss:$0 sm:$0xff] }
 0x14f   : > { %v2660_v6 = vpop.eup %2659  ;;  %v955_v56 = vadd.f32 1e-05, %v939_v24  ;;  %v764_v60 = vmul.f32 %v3227_v44, %v742_v58 }
 0x150   : > { %v956_v27 = vadd.f32 1e-05, %v940_v62  ;;  %v2662_v57 = vpop.eup %2661  ;;  %v743_v28 = vmul.f32 %v2660_v6, %v3045_v5  ;;  %v905_v18 = vpop.xlane.xlu1 %904  ;;  %2493 = vmatprep.mubr.msk.bf16.mxu1 %vm536_vm0, %v1048_v40  ;;  %v785_v2 = vadd.f32 %v3235_v38, %v763_v4  ;;  %v2646_v5 = vld [vmem:[%s3772_s8 + $0x8] sm:$0xff]  }
 0x151   : > { %v908_v45 = vpop.xlane.xlu0 %907  ;;  %v744_v61 = vmul.f32 %v2662_v57, %v3054_v55  ;;  %2671 = vrsqrt.f32 %v955_v56  ;;  %v941_v0 = vmul.f32 0.03125, %v905_v18  ;;  %v786_v46 = vadd.f32 %v3235_v38, %v764_v60  ;;  %v3275_v57 = vld [vmem:[%s3769_s5] ss:$0 sm:$0xff] }
 0x152   : > { %v942_v16 = vmul.f32 0.03125, %v908_v45  ;;  %2673 = vrsqrt.f32 %v956_v27  ;;  %v1049_v30 = vpack.c.bf16 %v785_v2, %v784_v19  ;;  %v765_v32 = vmul.f32 %v3227_v44, %v743_v28 }
 0x153   : > { %v2664_v10 = vpop.eup %2663  ;;  %v957_v34 = vadd.f32 1e-05, %v941_v0  ;;  %v766_v26 = vmul.f32 %v3227_v44, %v744_v61 }
 0x154   : > { %v958_v35 = vadd.f32 1e-05, %v942_v16  ;;  %v2666_v48 = vpop.eup %2665  ;;  %v745_v42 = vmul.f32 %v2664_v10, %v3057_v9  ;;  %v911_v20 = vpop.xlane.xlu1 %910  ;;  %2494 = vmatmul.mubr.msk.bf16.vlgmr.msra.gmra.mrb[0].mxu1 %vm536_vm0, %v1049_v30  ;;  %v787_v36 = vadd.f32 %v3235_v38, %v765_v32 }
 0x155   : > { %v914_v55 = vpop.xlane.xlu0 %913  ;;  %v984_v50 = vmul.f32 %v2666_v48, %v3066_v7  ;;  %2675 = vrsqrt.f32 %v957_v34  ;;  %v943_v11 = vmul.f32 0.03125, %v911_v20  ;;  %2502 = vmatpush3.bf16.msra.mxu1 %v3202_v41  ;;  %v788_v56 = vadd.f32 %v3235_v38, %v766_v26 }
 0x156   : > { %v944_v9 = vmul.f32 0.03125, %v914_v55  ;;  %2677 = vrsqrt.f32 %v958_v35  ;;  %v1050_v54 = vpack.c.bf16 %v787_v36, %v786_v46  ;;  %2503 = vmatprep.subr.bf16.mxu1 %v2646_v5  ;;  %v767_v52 = vmul.f32 %v3227_v44, %v745_v42 }
 0x157   : > { %v2668_v58 = vpop.eup %2667  ;;  %v959_v24 = vadd.f32 1e-05, %v943_v11  ;;  %v1006_v27 = vmul.f32 %v3263_v51, %v984_v50 }
 0x158   : > { %v960_v62 = vadd.f32 1e-05, %v944_v9  ;;  %v2670_v40 = vpop.eup %2669  ;;  %v985_v7 = vmul.f32 %v2668_v58, %v3069_v13  ;;  %v917_v4 = vpop.xlane.xlu1 %916  ;;  %2497 = vmatprep.mubr.msk.bf16.mxu1 %vm536_vm0, %v1050_v54  ;;  %v789_v41 = vadd.f32 %v3235_v38, %v767_v52 }
 0x159   : > { %v920_v6 = vpop.xlane.xlu0 %919  ;;  %v986_v28 = vmul.f32 %v2670_v40, %v3078_v1  ;;  %2679 = vrsqrt.f32 %v959_v24  ;;  %v945_v18 = vmul.f32 0.03125, %v917_v4  ;;  %2504 = vmatpush3.bf16.msra.mxu1 %v2646_v5  ;;  %v1028_v10 = vadd.f32 %v3275_v57, %v1006_v27 }
 0x15a   : > { %v946_v13 = vmul.f32 0.03125, %v920_v6  ;;  %2681 = vrsqrt.f32 %v960_v62  ;;  %v1051_v45 = vpack.c.bf16 %v789_v41, %v788_v56  ;;  %v1007_v19 = vmul.f32 %v3263_v51, %v985_v7 }
 0x15b   : > { %v2672_v2 = vpop.eup %2671  ;;  %v1008_v60 = vmul.f32 %v3263_v51, %v986_v28  ;;  %v961_v61 = vadd.f32 1e-05, %v945_v18 }
 0x15c   : > { %v962_v0 = vadd.f32 1e-05, %v946_v13  ;;  %v2674_v16 = vpop.eup %2673  ;;  %v987_v30 = vmul.f32 %v2672_v2, %v3081_v17  ;;  %v923_v32 = vpop.xlane.xlu1 %922  ;;  %2498 = vmatmul.mubr.msk.bf16.gmra.mrb[4].mxu1 %vm536_vm0, %v1051_v45  ;;  %v1029_v5 = vadd.f32 %v3275_v57, %v1007_v19 }
 0x15d   : > { %v926_v1 = vpop.xlane.xlu0 %925  ;;  %v988_v34 = vmul.f32 %v2674_v16, %v3090_v43  ;;  %2683 = vrsqrt.f32 %v961_v61  ;;  %v947_v35 = vmul.f32 0.03125, %v923_v32  ;;  %v1030_v17 = vadd.f32 %v3275_v57, %v1008_v60 }
 0x15e   : > { %v1009_v48 = vmul.f32 %v3263_v51, %v987_v30  ;;  %2685 = vrsqrt.f32 %v962_v0  ;;  %v948_v42 = vmul.f32 0.03125, %v926_v1  ;;  %v1196_v20 = vpack.c.bf16 %v1029_v5, %v1028_v10 }
 0x15f   : > { %v2676_v55 = vpop.eup %2675  ;;  %v963_v46 = vadd.f32 1e-05, %v947_v35  ;;  %v1010_v54 = vmul.f32 %v3263_v51, %v988_v34 }
 0x160   : > { %v2678_v36 = vpop.eup %2677  ;;  %v1031_v26 = vadd.f32 %v3275_v57, %v1009_v48  ;;  %v989_v50 = vmul.f32 %v2676_v55, %v3093_v21  ;;  %v964_v11 = vadd.f32 1e-05, %v948_v42  ;;  %v929_v9 = vpop.xlane.xlu1 %928  ;;  %2505 = vmatprep.mubr.msk.bf16.mxu1 %vm536_vm0, %v1196_v20 }
 0x161   : > { %v932_v43 = vpop.xlane.xlu0 %931  ;;  %v990_v52 = vmul.f32 %v2678_v36, %v3102_v59  ;;  %2687 = vrsqrt.f32 %v963_v46  ;;  %v949_v58 = vmul.f32 0.03125, %v929_v9  ;;  %v1032_v28 = vadd.f32 %v3275_v57, %v1010_v54 }
 0x162   : > { %v950_v24 = vmul.f32 0.03125, %v932_v43  ;;  %2689 = vrsqrt.f32 %v964_v11  ;;  %v1197_v62 = vpack.c.bf16 %v1031_v26, %v1030_v17  ;;  %v1011_v40 = vmul.f32 %v3263_v51, %v989_v50 }
 0x163   : > { %v2680_v7 = vpop.eup %2679  ;;  %v965_v4 = vadd.f32 1e-05, %v949_v58  ;;  %v1012_v18 = vmul.f32 %v3263_v51, %v990_v52 }
 0x164   : > { %v966_v6 = vadd.f32 1e-05, %v950_v24  ;;  %v2682_v21 = vpop.eup %2681  ;;  %v991_v56 = vmul.f32 %v2680_v7, %v3105_v25  ;;  %v935_v41 = vpop.xlane.xlu1 %934  ;;  %2506 = vmatmul.mubr.msk.bf16.vlgmr.msra.gmra.mrb[8].mxu1 %vm536_vm0, %v1197_v62  ;;  %v1033_v59 = vadd.f32 %v3275_v57, %v1011_v40 }
 0x165   : > { %v636_v27 = vpop.xlane.xlu0 %635  ;;  %v992_v13 = vmul.f32 %v2682_v21, %v3114_v15  ;;  %2691 = vrsqrt.f32 %v965_v4  ;;  %v951_v45 = vmul.f32 0.03125, %v935_v41  ;;  %v1034_v10 = vadd.f32 %v3275_v57, %v1012_v18 }
 0x166   : > { %v682_v19 = vmul.f32 0.03125, %v636_v27  ;;  %2693 = vrsqrt.f32 %v966_v6  ;;  %v1198_v2 = vpack.c.bf16 %v1033_v59, %v1032_v28  ;;  %v1013_v60 = vmul.f32 %v3263_v51, %v991_v56 }
 0x167   : > { %v2684_v25 = vpop.eup %2683  ;;  %v967_v61 = vadd.f32 1e-05, %v951_v45  ;;  %v1014_v5 = vmul.f32 %v3263_v51, %v992_v13 }
 0x168   : > { %v698_v0 = vadd.f32 1e-05, %v682_v19  ;;  %v2686_v16 = vpop.eup %2685  ;;  %v993_v30 = vmul.f32 %v2684_v25, %v3117_v29  ;;  %v639_v32 = vpop.xlane.xlu1 %638  ;;  %2509 = vmatprep.mubr.msk.bf16.mxu1 %vm536_vm0, %v1198_v2  ;;  %v1035_v15 = vadd.f32 %v3275_v57, %v1013_v60 }
 0x169   : > { %v642_v1 = vpop.xlane.xlu0 %641  ;;  %v994_v34 = vmul.f32 %v2686_v16, %v3126_v31  ;;  %2695 = vrsqrt.f32 %v967_v61  ;;  %v683_v35 = vmul.f32 0.03125, %v639_v32  ;;  %v1036_v11 = vadd.f32 %v3275_v57, %v1014_v5 }
 0x16a   : > { %v684_v48 = vmul.f32 0.03125, %v642_v1  ;;  %2697 = vrsqrt.f32 %v698_v0  ;;  %v1199_v42 = vpack.c.bf16 %v1035_v15, %v1034_v10  ;;  %v1015_v20 = vmul.f32 %v3263_v51, %v993_v30 }
 0x16b   : > { %v2688_v29 = vpop.eup %2687  ;;  %v699_v55 = vadd.f32 1e-05, %v683_v35  ;;  %v1016_v9 = vmul.f32 %v3263_v51, %v994_v34 }
 0x16c   : > { %v700_v17 = vadd.f32 1e-05, %v684_v48  ;;  %v2690_v46 = vpop.eup %2689  ;;  %v995_v36 = vmul.f32 %v2688_v29, %v3129_v33  ;;  %v645_v26 = vpop.xlane.xlu1 %644  ;;  %2510 = vmatmul.mubr.msk.bf16.gmra.mrb[12].mxu1 %vm536_vm0, %v1199_v42  ;;  %v1037_v31 = vadd.f32 %v3275_v57, %v1015_v20 }
 0x16d   : > { %v648_v50 = vpop.xlane.xlu0 %647  ;;  %v996_v43 = vmul.f32 %v2690_v46, %v3138_v47  ;;  %2699 = vrsqrt.f32 %v699_v55  ;;  %v685_v54 = vmul.f32 0.03125, %v645_v26  ;;  %v1038_v56 = vadd.f32 %v3275_v57, %v1016_v9 }
 0x16e   : > { %v686_v52 = vmul.f32 0.03125, %v648_v50  ;;  %2701 = vrsqrt.f32 %v700_v17  ;;  %v1200_v58 = vpack.c.bf16 %v1037_v31, %v1036_v11  ;;  %v1017_v24 = vmul.f32 %v3263_v51, %v995_v36 }
 0x16f   : > { %v2692_v33 = vpop.eup %2691  ;;  %v701_v62 = vadd.f32 1e-05, %v685_v54  ;;  %v1018_v41 = vmul.f32 %v3263_v51, %v996_v43 }
 0x170   : > { %v702_v40 = vadd.f32 1e-05, %v686_v52  ;;  %v2694_v7 = vpop.eup %2693  ;;  %v997_v4 = vmul.f32 %v2692_v33, %v3141_v37  ;;  %v651_v6 = vpop.xlane.xlu1 %650  ;;  %2513 = vmatprep.mubr.msk.bf16.mxu1 %vm536_vm0, %v1200_v58  ;;  %v1039_v47 = vadd.f32 %v3275_v57, %v1017_v24 }
 0x171   : > { %v654_v21 = vpop.xlane.xlu0 %653  ;;  %v998_v27 = vmul.f32 %v2694_v7, %v3153_v63  ;;  %2703 = vrsqrt.f32 %v701_v62  ;;  %v687_v28 = vmul.f32 0.03125, %v651_v6  ;;  %v1040_v61 = vadd.f32 %v3275_v57, %v1018_v41 }
 0x172   : > { %v688_v59 = vmul.f32 0.03125, %v654_v21  ;;  %2705 = vrsqrt.f32 %v702_v40  ;;  %v1201_v18 = vpack.c.bf16 %v1039_v47, %v1038_v56  ;;  %v1019_v13 = vmul.f32 %v3263_v51, %v997_v4 }
 0x173   : > { %v2696_v37 = vpop.eup %2695  ;;  %v703_v45 = vadd.f32 1e-05, %v687_v28  ;;  %v1020_v0 = vmul.f32 %v3263_v51, %v998_v27 }
 0x174   : > { %v704_v19 = vadd.f32 1e-05, %v688_v59  ;;  %v2698_v2 = vpop.eup %2697  ;;  %v999_v60 = vmul.f32 %v2696_v37, %v3156_v3  ;;  %v657_v25 = vpop.xlane.xlu1 %656  ;;  %2514 = vmatmul.mubr.msk.bf16.gmra.mrb[16].mxu1 %vm536_vm0, %v1201_v18  ;;  %v1041_v63 = vadd.f32 %v3275_v57, %v1019_v13 }
 0x175   : > { %2707 = vrsqrt.f32 %v703_v45  ;;  %v689_v16 = vmul.f32 0.03125, %v657_v25  ;;  %v730_v30 = vmul.f32 %v2698_v2, %v3168_v22  ;;  %v1042_v5 = vadd.f32 %v3275_v57, %v1020_v0 }
 0x176   : > { %2709 = vrsqrt.f32 %v704_v19  ;;  %v1202_v32 = vpack.c.bf16 %v1041_v63, %v1040_v61  ;;  %v1021_v1 = vmul.f32 %v3263_v51, %v999_v60 }
 0x177   : > { %v2700_v10 = vpop.eup %2699  ;;  %v705_v15 = vadd.f32 1e-05, %v689_v16  ;;  %v752_v48 = vmul.f32 %v3227_v44, %v730_v30 }
 0x178   : > { %v2702_v3 = vpop.eup %2701  ;;  %2517 = vmatprep.mubr.msk.bf16.mxu1 %vm536_vm0, %v1202_v32  ;;  %v1043_v34 = vadd.f32 %v3275_v57, %v1021_v1  ;;  %v731_v35 = vmul.f32 %v2700_v10, %v3171_v23 }
 0x179   : > { %v732_v42 = vmul.f32 %v2702_v3, %v3180_v49  ;;  %2711 = vrsqrt.f32 %v705_v15  ;;  %v774_v17 = vadd.f32 %v3235_v38, %v752_v48 }
 0x17a   : > { %v1203_v22 = vpack.c.bf16 %v1043_v34, %v1042_v5  ;;  %v753_v20 = vmul.f32 %v3227_v44, %v731_v35 }
 0x17b   : > { %v2704_v51 = vpop.eup %2703  ;;  %v754_v23 = vmul.f32 %v3227_v44, %v732_v42  ;;  %v3410_v42 = vld [vmem:[%s3773_s9] ss:$0 sm:$0xff] }
 0x17c   : > { %v2706_v29 = vpop.eup %2705  ;;  %v733_v55 = vmul.f32 %v2704_v51, %v3183_v39  ;;  %2518 = vmatmul.mubr.msk.bf16.gmra.mrb[20].mxu1 %vm536_vm0, %v1203_v22  ;;  %v775_v57 = vadd.f32 %v3235_v38, %v753_v20 }
 0x17d   : > { %v734_v46 = vmul.f32 %v2706_v29, %v3192_v8  ;;  %v776_v39 = vadd.f32 %v3235_v38, %v754_v23 }
 0x17e   : > { %v1044_v36 = vpack.c.bf16 %v775_v57, %v774_v17  ;;  %v755_v49 = vmul.f32 %v3227_v44, %v733_v55 }
 0x17f   : > { %v2708_v26 = vpop.eup %2707  ;;  %v756_v9 = vmul.f32 %v3227_v44, %v734_v46 }
 0x180   : > { %v2710_v50 = vpop.eup %2709  ;;  %v735_v11 = vmul.f32 %v2708_v26, %v3195_v53  ;;  %2485 = vmatprep.mubr.msk.bf16.mxu0 %vm536_vm0, %v1044_v36  ;;  %v777_v31 = vadd.f32 %v3235_v38, %v755_v49 }
 0x181   : > { %v736_v43 = vmul.f32 %v2710_v50, %v3210_v12  ;;  %v778_v53 = vadd.f32 %v3235_v38, %v756_v9 }
 0x182   : > { %v1045_v54 = vpack.c.bf16 %v777_v31, %v776_v39  ;;  %v757_v8 = vmul.f32 %v3227_v44, %v735_v11 }
 0x183   : > { %v2712_v52 = vpop.eup %2711  ;;  %v758_v33 = vmul.f32 %v3227_v44, %v736_v43 }
 0x184   : > { %v737_v58 = vmul.f32 %v2712_v52, %v3213_v14  ;;  %2486 = vmatmul.mubr.msk.bf16.vlgmr.msra.gmra.mrb[0].mxu0 %vm536_vm0, %v1045_v54  ;;  %v779_v24 = vadd.f32 %v3235_v38, %v757_v8  ;;  %v3362_v14 = vld [vmem:[%s3771_s7] ss:$0 sm:$0xff] }
 0x185   : > { %v780_v12 = vadd.f32 %v3235_v38, %v758_v33 }
 0x186   : > { %v1046_v62 = vpack.c.bf16 %v779_v24, %v778_v53  ;;  %v759_v40 = vmul.f32 %v3227_v44, %v737_v58 }
 0x188   : > { %2489 = vmatprep.mubr.msk.bf16.mxu0 %vm536_vm0, %v1046_v62  ;;  %v781_v7 = vadd.f32 %v3235_v38, %v759_v40 }
 0x18a   : > { %v1047_v4 = vpack.c.bf16 %v781_v7, %v780_v12 }
 0x18c   : > { %2490 = vmatmul.mubr.msk.bf16.gmra.mrb[4].mxu0 %vm536_vm0, %v1047_v4 }
 0x227   : > { %v2495_v6 = vpop.f32.mrb[0].mxu1 }
 0x228   : > { %v1165_v21 = vpop.f32.mrb[1].mxu1  ;;  %v3365_v56 = vadd.f32 %v2495_v6, %v3362_v14 }
 0x229   : > { %v3368_v44 = vadd.f32 %v3362_v14, %v1165_v21  ;;  %v2496_v47 = vpop.f32.mrb[2].mxu1 }
 0x22a   : > { %v1168_v41 = vpop.f32.mrb[3].mxu1  ;;  %v3373_v27 = vadd.f32 %v2496_v47, %v3362_v14  ;;  %v1436_v59 = vmul.f32 %v3365_v56, %v3365_v56 }
 0x22b   : > { %v1434_v38 = vmul.f32 %v3368_v44, %v3368_v44  ;;  %v3376_v28 = vadd.f32 %v3362_v14, %v1168_v41 }
 0x22c   : > { %v1437_v37 = vmul.f32 %v3373_v27, %v3373_v27  ;;  %v1466_v25 = vsel %vm536_vm0, %v1436_v59, 0.0 }
 0x22d   : > { %v1435_v18 = vmul.f32 %v3376_v28, %v3376_v28  ;;  %v1463_v13 = vsel %vm536_vm0, %v1434_v38, 0.0 }
 0x22e   : > { %v1468_v32 = vsel %vm536_vm0, %v1437_v37, 0.0 }
 0x22f   : > { %v1464_v45 = vsel %vm536_vm0, %v1435_v18, 0.0  ;;  %v2499_v19 = vpop.f32.mrb[4].mxu1 }
 0x230   : > { %v1465_v2 = vadd.f32 %v1464_v45, %v1463_v13  ;;  %v1181_v60 = vpop.f32.mrb[5].mxu1  ;;  %v3388_v61 = vadd.f32 %v2499_v19, %v3362_v14 }
 0x231   : > { %v3391_v63 = vadd.f32 %v3362_v14, %v1181_v60  ;;  %v2500_v0 = vpop.f32.mrb[6].mxu1 }
 0x232   : > { %v1467_v16 = vadd.f32 %v1466_v25, %v1465_v2  ;;  %v1184_v30 = vpop.f32.mrb[7].mxu1  ;;  %v3397_v10 = vadd.f32 %v2500_v0, %v3362_v14  ;;  %v1440_v5 = vmul.f32 %v3388_v61, %v3388_v61 }
 0x233   : > { %v1438_v1 = vmul.f32 %v3391_v63, %v3391_v63  ;;  %v3400_v15 = vadd.f32 %v3362_v14, %v1184_v30 }
 0x234   : > { %v1469_v3 = vadd.f32 %v1468_v32, %v1467_v16  ;;  %v1441_v22 = vmul.f32 %v3397_v10, %v3397_v10  ;;  %v1474_v17 = vsel %vm536_vm0, %v1440_v5, 0.0 }
 0x235   : > { %v1470_v34 = vsel %vm536_vm0, %v1438_v1, 0.0  ;;  %v1439_v35 = vmul.f32 %v3400_v15, %v3400_v15 }
 0x236   : > { %v1471_v48 = vadd.f32 %v1470_v34, %v1469_v3  ;;  %v1476_v26 = vsel %vm536_vm0, %v1441_v22, 0.0 }
 0x237   : > { %v1472_v20 = vsel %vm536_vm0, %v1439_v35, 0.0  ;;  %v2507_v51 = vpop.f32.mrb[8].mxu1 }
 0x238   : > { %v1473_v29 = vadd.f32 %v1472_v20, %v1471_v48  ;;  %v1285_v55 = vpop.f32.mrb[9].mxu1  ;;  %v3417_v57 = vadd.f32 %v2507_v51, %v3410_v42 }
 0x239   : > { %v3420_v23 = vadd.f32 %v3410_v42, %v1285_v55  ;;  %v2508_v46 = vpop.f32.mrb[10].mxu1 }
 0x23a   : > { %v1475_v36 = vadd.f32 %v1474_v17, %v1473_v29  ;;  %v1288_v49 = vpop.f32.mrb[11].mxu1  ;;  %v3426_v11 = vadd.f32 %v2508_v46, %v3410_v42  ;;  %v1350_v9 = vmul.f32 %v3417_v57, %v3417_v57 }
 0x23b   : > { %v1348_v50 = vmul.f32 %v3420_v23, %v3420_v23  ;;  %v3429_v39 = vadd.f32 %v3410_v42, %v1288_v49 }
 0x23c   : > { %v1477_v31 = vadd.f32 %v1476_v26, %v1475_v36  ;;  %v1351_v52 = vmul.f32 %v3426_v11, %v3426_v11  ;;  %v1367_v40 = vsel %vm536_vm0, %v1350_v9, 0.0 }
 0x23d   : > { %v1349_v43 = vmul.f32 %v3429_v39, %v3429_v39  ;;  %v1364_v8 = vsel %vm536_vm0, %v1348_v50, 0.0 }
 0x23e   : > { %v1478_v54 = vrot.slane %v1477_v31, 4  ;;  %v1369_v41 = vsel %vm536_vm0, %v1351_v52, 0.0 }
 0x23f   : > { %v1365_v58 = vsel %vm536_vm0, %v1349_v43, 0.0  ;;  %v2511_v53 = vpop.f32.mrb[12].mxu1 }
 0x240   : > { %v1479_v24 = vadd.f32 %v1478_v54, %v1477_v31  ;;  %v1366_v33 = vadd.f32 %v1365_v58, %v1364_v8  ;;  %v1301_v62 = vpop.f32.mrb[13].mxu1  ;;  %v3441_v12 = vadd.f32 %v2511_v53, %v3410_v42 }
 0x241   : > { %v3444_v7 = vadd.f32 %v3410_v42, %v1301_v62  ;;  %v2512_v4 = vpop.f32.mrb[14].mxu1 }
 0x242   : > { %v1480_v6 = vrot.slane %v1479_v24, 2  ;;  %v1368_v21 = vadd.f32 %v1367_v40, %v1366_v33  ;;  %v1304_v47 = vpop.f32.mrb[15].mxu1  ;;  %v3450_v59 = vadd.f32 %v2512_v4, %v3410_v42  ;;  %v1354_v45 = vmul.f32 %v3441_v12, %v3441_v12 }
 0x243   : > { %v1352_v38 = vmul.f32 %v3444_v7, %v3444_v7  ;;  %v3453_v18 = vadd.f32 %v3410_v42, %v1304_v47 }
 0x244   : > { %v1481_v13 = vadd.f32 %v1480_v6, %v1479_v24  ;;  %v1370_v37 = vadd.f32 %v1369_v41, %v1368_v21  ;;  %v1355_v0 = vmul.f32 %v3450_v59, %v3450_v59  ;;  %v1375_v5 = vsel %vm536_vm0, %v1354_v45, 0.0 }
 0x245   : > { %v1371_v19 = vsel %vm536_vm0, %v1352_v38, 0.0  ;;  %v1353_v2 = vmul.f32 %v3453_v18, %v3453_v18 }
 0x246   : > { %v1482_v60 = vrot.slane %v1481_v13, 1  ;;  %v1372_v25 = vadd.f32 %v1371_v19, %v1370_v37  ;;  %v1377_v29 = vsel %vm536_vm0, %v1355_v0, 0.0 }
 0x247   : > { %v1373_v16 = vsel %vm536_vm0, %v1353_v2, 0.0  ;;  %v2515_v30 = vpop.f32.mrb[16].mxu1 }
 0x248   : > { %v1483_v32 = vadd.f32 %v1482_v60, %v1481_v13  ;;  %v1374_v1 = vadd.f32 %v1373_v16, %v1372_v25  ;;  %v1317_v3 = vpop.f32.mrb[17].mxu1  ;;  %v3465_v34 = vadd.f32 %v2515_v30, %v3410_v42 }
 0x249   : > { %v3468_v35 = vadd.f32 %v3410_v42, %v1317_v3  ;;  %v2516_v48 = vpop.f32.mrb[18].mxu1 }
 0x24a   : > { %v1485_v22 = vmax.f32 %v1483_v32, 1e-24  ;;  %v1376_v20 = vadd.f32 %v1375_v5, %v1374_v1  ;;  %v1320_v51 = vpop.f32.mrb[19].mxu1  ;;  %v3474_v17 = vadd.f32 %v2516_v48, %v3410_v42  ;;  %v1358_v49 = vmul.f32 %v3465_v34, %v3465_v34 }
 0x24b   : > { %v1356_v55 = vmul.f32 %v3468_v35, %v3468_v35  ;;  %v3477_v46 = vadd.f32 %v3410_v42, %v1320_v51 }
 0x24c   : > { %2713 = vrsqrt.f32 %v1485_v22  ;;  %v1378_v36 = vadd.f32 %v1377_v29, %v1376_v20  ;;  %v1359_v9 = vmul.f32 %v3474_v17, %v3474_v17  ;;  %v1388_v24 = vsel %vm536_vm0, %v1358_v49, 0.0 }
 0x24d   : > { %v1357_v26 = vmul.f32 %v3477_v46, %v3477_v46  ;;  %v1385_v31 = vsel %vm536_vm0, %v1356_v55, 0.0 }
 0x24e   : > { %v1379_v50 = vrot.slane %v1378_v36, 4  ;;  %v1390_v47 = vsel %vm536_vm0, %v1359_v9, 0.0 }
 0x24f   : > { %v1386_v43 = vsel %vm536_vm0, %v1357_v26, 0.0  ;;  %v2519_v54 = vpop.f32.mrb[20].mxu1 }
 0x250   : > { %v1380_v8 = vadd.f32 %v1379_v50, %v1378_v36  ;;  %v1387_v52 = vadd.f32 %v1386_v43, %v1385_v31  ;;  %v3488_v58 = vadd.f32 %v2519_v54, %v3410_v42  ;;  %v1333_v53 = vpop.f32.mrb[21].mxu1 }
 0x251   : > { %v3492_v33 = vadd.f32 %v3410_v42, %v1333_v53  ;;  %v2520_v62 = vpop.f32.mrb[22].mxu1 }
 0x252   : > { %v1381_v40 = vrot.slane %v1380_v8, 2  ;;  %v1389_v4 = vadd.f32 %v1388_v24, %v1387_v52  ;;  %v1362_v6 = vmul.f32 %v3488_v58, %v3488_v58  ;;  %v1336_v21 = vpop.f32.mrb[23].mxu1  ;;  %v3500_v38 = vadd.f32 %v2520_v62, %v3410_v42 }
 0x253   : > { %v1360_v41 = vmul.f32 %v3492_v33, %v3492_v33  ;;  %v3503_v13 = vadd.f32 %v3410_v42, %v1336_v21 }
 0x254   : > { %v1382_v37 = vadd.f32 %v1381_v40, %v1380_v8  ;;  %v1391_v45 = vadd.f32 %v1390_v47, %v1389_v4  ;;  %v1396_v0 = vsel %vm536_vm0, %v1362_v6, 0.0  ;;  %v1363_v30 = vmul.f32 %v3500_v38, %v3500_v38 }
 0x255   : > { %v1392_v19 = vsel %vm536_vm0, %v1360_v41, 0.0  ;;  %v1361_v2 = vmul.f32 %v3503_v13, %v3503_v13 }
 0x256   : > { %v2714_v60 = vpop.eup %2713  ;;  %v1383_v25 = vrot.slane %v1382_v37, 1  ;;  %v1393_v16 = vadd.f32 %v1392_v19, %v1391_v45  ;;  %v1398_v8 = vsel %vm536_vm0, %v1363_v30, 0.0 }
 0x257   : > { %v1394_v32 = vsel %vm536_vm0, %v1361_v2, 0.0  ;;  %v2487_v1 = vpop.f32.mrb[0].mxu0  ;;  %v1496_v42 = vmul.f32 %v2714_v60, %v3368_v44  ;;  %v1497_v3 = vmul.f32 %v2714_v60, %v3376_v28  ;;  %v1501_v5 = vmul.f32 %v2714_v60, %v3400_v15 }
 0x258   : > { %v1384_v48 = vadd.f32 %v1383_v25, %v1382_v37  ;;  %v1395_v22 = vadd.f32 %v1394_v32, %v1393_v16  ;;  %v1133_v20 = vpop.f32.mrb[1].mxu0  ;;  %v1498_v51 = vmul.f32 %v2714_v60, %v3365_v56  ;;  %v3517_v29 = vadd.f32 %v2487_v1, %v3362_v14 }
 0x259   : > { %v3520_v55 = vadd.f32 %v3362_v14, %v1133_v20  ;;  %v2488_v36 = vpop.f32.mrb[2].mxu0  ;;  %v1516_v49 = vpack.c.bf16 %v1497_v3, %v1496_v42  ;;  %v1499_v26 = vmul.f32 %v2714_v60, %v3373_v27  ;;  %v1500_v54 = vmul.f32 %v2714_v60, %v3391_v63 }
 0x25a   : > { %v1406_v50 = vmax.f32 %v1384_v48, 1e-24  ;;  %v1397_v31 = vadd.f32 %v1396_v0, %v1395_v22  ;;  %v3524_v9 = vadd.f32 %v2488_v36, %v3362_v14  ;;  %v1136_v43 = vpop.f32.mrb[3].mxu0  ;;  %v1428_v40 = vmul.f32 %v3517_v29, %v3517_v29 }
 0x25b   : > { %v1426_v52 = vmul.f32 %v3520_v55, %v3520_v55  ;;  %v3531_v53 = vadd.f32 %v3362_v14, %v1136_v43  ;;  %2533 = vmatprep.subr.bf16.mxu1 %v1516_v49  ;;  %v1517_v24 = vpack.c.bf16 %v1499_v26, %v1498_v51  ;;  %v1518_v47 = vpack.c.bf16 %v1501_v5, %v1500_v54 }
 0x25c   : > { %2715 = vrsqrt.f32 %v1406_v50  ;;  %v1399_v62 = vadd.f32 %v1398_v8, %v1397_v31  ;;  %2534 = vmatpush3.bf16.msra.mxu1 %v1516_v49  ;;  %v1429_v21 = vmul.f32 %v3524_v9, %v3524_v9  ;;  %v1502_v19 = vmul.f32 %v2714_v60, %v3388_v61 }
 0x25d   : > { %v1427_v4 = vmul.f32 %v3531_v53, %v3531_v53  ;;  %2535 = vmatprep.subr.bf16.mxu1 %v1517_v24  ;;  %v1442_v41 = vsel %vm536_vm0, %v1426_v52, 0.0  ;;  %v1503_v2 = vmul.f32 %v2714_v60, %v3397_v10  ;;  %v1445_v32 = vsel %vm536_vm0, %v1428_v40, 0.0 }
 0x25e   : > { %v1400_v6 = vrot.slane %v1399_v62, 4  ;;  %v1447_v20 = vsel %vm536_vm0, %v1429_v21, 0.0 }
 0x25f   : > { %v1443_v37 = vsel %vm536_vm0, %v1427_v4, 0.0  ;;  %v2491_v45 = vpop.f32.mrb[4].mxu0  ;;  %v1519_v49 = vpack.c.bf16 %v1503_v2, %v1502_v19 }
 0x260   : > { %v1401_v25 = vadd.f32 %v1400_v6, %v1399_v62  ;;  %v1444_v0 = vadd.f32 %v1443_v37, %v1442_v41  ;;  %v3544_v16 = vadd.f32 %v2491_v45, %v3362_v14  ;;  %v1149_v30 = vpop.f32.mrb[5].mxu0  ;;  %2536 = vmatpush3.bf16.msra.mxu1 %v1517_v24 }
 0x261   : > { %v3548_v1 = vadd.f32 %v3362_v14, %v1149_v30  ;;  %v2492_v42 = vpop.f32.mrb[6].mxu0  ;;  %2537 = vmatprep.subr.bf16.mxu1 %v1518_v47 }
 0x262   : > { %v1402_v3 = vrot.slane %v1401_v25, 2  ;;  %v1446_v5 = vadd.f32 %v1445_v32, %v1444_v0  ;;  %v1432_v48 = vmul.f32 %v3544_v16, %v3544_v16  ;;  %v3553_v60 = vadd.f32 %v2492_v42, %v3362_v14  ;;  %v1152_v22 = vpop.f32.mrb[7].mxu0 }
 0x263   : > { %v1430_v51 = vmul.f32 %v3548_v1, %v3548_v1  ;;  %v3559_v36 = vadd.f32 %v3362_v14, %v1152_v22 }
 0x264   : > { %v1403_v26 = vadd.f32 %v1402_v3, %v1401_v25  ;;  %v1448_v50 = vadd.f32 %v1447_v20, %v1446_v5  ;;  %2538 = vmatpush3.bf16.msra.mxu1 %v1518_v47  ;;  %v1453_v52 = vsel %vm536_vm0, %v1432_v48, 0.0  ;;  %v1433_v62 = vmul.f32 %v3553_v60, %v3553_v60 }
 0x265   : > { %v1449_v31 = vsel %vm536_vm0, %v1430_v51, 0.0  ;;  %v1431_v43 = vmul.f32 %v3559_v36, %v3559_v36  ;;  %2539 = vmatprep.subr.bf16.mxu1 %v1519_v49 }
 0x266   : > { %v2716_v54 = vpop.eup %2715  ;;  %v1404_v8 = vrot.slane %v1403_v26, 1  ;;  %v1450_v24 = vadd.f32 %v1449_v31, %v1448_v50 }
 0x267   : > { %v1415_v14 = vmul.f32 %v2716_v54, %v3453_v18  ;;  %v1451_v40 = vsel %vm536_vm0, %v1431_v43, 0.0  ;;  %v1410_v4 = vmul.f32 %v2716_v54, %v3420_v23  ;;  %v1411_v6 = vmul.f32 %v2716_v54, %v3429_v39 }
 0x268   : > { %v1405_v21 = vadd.f32 %v1404_v8, %v1403_v26  ;;  %v1452_v47 = vadd.f32 %v1451_v40, %v1450_v24  ;;  %2540 = vmatpush3.bf16.msra.mxu1 %v1519_v49  ;;  %v1412_v41 = vmul.f32 %v2716_v54, %v3417_v57  ;;  %v1413_v37 = vmul.f32 %v2716_v54, %v3426_v11 }
 0x269   : > { %v1504_v45 = vpack.c.bf16 %v1411_v6, %v1410_v4  ;;  %v1414_v19 = vmul.f32 %v2716_v54, %v3444_v7  ;;  %v1416_v2 = vmul.f32 %v2716_v54, %v3441_v12  ;;  %v1417_v18 = vmul.f32 %v2716_v54, %v3450_v59 }
 0x26a   : > { %v1407_v25 = vmax.f32 %v1405_v21, 1e-24  ;;  %v1454_v0 = vadd.f32 %v1453_v52, %v1452_v47  ;;  %v1505_v30 = vpack.c.bf16 %v1413_v37, %v1412_v41  ;;  %v1455_v23 = vsel %vm536_vm0, %v1433_v62, 0.0 }
 0x26b   : > { %1520 = vxpose.xlu0.c.b16.start [1/4] (short) (narrow) %v1504_v45, 32  ;;  %v1506_v39 = vpack.c.bf16 %v1415_v14, %v1414_v19  ;;  %v1507_v32 = vpack.c.bf16 %v1417_v18, %v1416_v2  ;;  %v2374_v45 = vld [vmem:[%s3776_s12] ss:$0 sm:$0xff] }
 0x26c   : > { %2717 = vrsqrt.f32 %v1407_v25  ;;  %v1456_v42 = vadd.f32 %v1455_v23, %v1454_v0  ;;  %v1678_v18 = vld [vmem:[%s3777_s13] sm:$0xff] }
 0x26e   : > { %v1457_v57 = vrot.slane %v1456_v42, 4 }
 0x26f   : > { %1521 = vxpose.xlu0.c.b16.cont [2/4] (short) (narrow) %v1505_v30, 32 }
 0x270   : > { %v1458_v11 = vadd.f32 %v1457_v57, %v1456_v42 }
 0x272   : > { %v1459_v3 = vrot.slane %v1458_v11, 2 }
 0x273   : > { %1522 = vxpose.xlu0.c.b16.cont [3/4] (short) (narrow) %v1506_v39, 32  ;;  %v1679_v39 = vld [vmem:[%s3777_s13 + $0x8] sm:$0xff] }
 0x274   : > { %v1460_v7 = vadd.f32 %v1459_v3, %v1458_v11  ;;  %v1681_v3 = vld [vmem:[%s3777_s13 + $0x18] sm:$0xff] }
 0x276   : > { %v2718_v5 = vpop.eup %2717  ;;  %v1461_v12 = vrot.slane %v1460_v7, 1 }
 0x277   : > { %v1423_v59 = vmul.f32 %v2718_v5, %v3503_v13  ;;  %1523 = vxpose.xlu0.c.b16.end [4/4] (short) (narrow) %v1507_v32, 32  ;;  %v1418_v48 = vmul.f32 %v2718_v5, %v3468_v35  ;;  %v1419_v22 = vmul.f32 %v2718_v5, %v3477_v46  ;;  %v1420_v20 = vmul.f32 %v2718_v5, %v3465_v34  ;;  %v1680_v32 = vld [vmem:[%s3777_s13 + $0x10] sm:$0xff] }
 0x278   : > { %v1462_v51 = vadd.f32 %v1461_v12, %v1460_v7  ;;  %v1421_v49 = vmul.f32 %v2718_v5, %v3474_v17  ;;  %v1422_v26 = vmul.f32 %v2718_v5, %v3492_v33  ;;  %v1424_v50 = vmul.f32 %v2718_v5, %v3488_v58 }
 0x279   : > { %v1508_v31 = vpack.c.bf16 %v1419_v22, %v1418_v48  ;;  %v1425_v43 = vmul.f32 %v2718_v5, %v3500_v38 }
 0x27a   : > { %v1484_v54 = vmax.f32 %v1462_v51, 1e-24  ;;  %v1509_v8 = vpack.c.bf16 %v1421_v49, %v1420_v20  ;;  %v1510_v13 = vpack.c.bf16 %v1423_v59, %v1422_v26 }
 0x27b   : > { %1592 = vxpose.xlu1.c.b16.start [1/4] (short) (narrow) %v1508_v31, 32  ;;  %v1511_v52 = vpack.c.bf16 %v1425_v43, %v1424_v50 }
 0x27c   : > { %2719 = vrsqrt.f32 %v1484_v54 }
 0x27f   : > { %1593 = vxpose.xlu1.c.b16.cont [2/4] (short) (narrow) %v1509_v8, 32 }
 0x283   : > { %1594 = vxpose.xlu1.c.b16.cont [3/4] (short) (narrow) %v1510_v13, 32 }
 0x286   : > { %v2720_v35 = vpop.eup %2719 }
 0x287   : > { %1595 = vxpose.xlu1.c.b16.end [4/4] (short) (narrow) %v1511_v52, 32  ;;  %v1488_v34 = vmul.f32 %v2720_v35, %v3520_v55  ;;  %v1489_v17 = vmul.f32 %v2720_v35, %v3531_v53  ;;  %v1490_v46 = vmul.f32 %v2720_v35, %v3517_v29  ;;  %v1491_v58 = vmul.f32 %v2720_v35, %v3524_v9 }
 0x288   : > { %v1493_v38 = vmul.f32 %v2720_v35, %v3559_v36  ;;  %v1492_v62 = vmul.f32 %v2720_v35, %v3548_v1  ;;  %v1494_v40 = vmul.f32 %v2720_v35, %v3544_v16  ;;  %v1495_v4 = vmul.f32 %v2720_v35, %v3553_v60 }
 0x289   : > { %v1512_v33 = vpack.c.bf16 %v1489_v17, %v1488_v34  ;;  %v1513_v24 = vpack.c.bf16 %v1491_v58, %v1490_v46 }
 0x28a   : > { %v1514_v14 = vpack.c.bf16 %v1493_v38, %v1492_v62  ;;  %v1515_v6 = vpack.c.bf16 %v1495_v4, %v1494_v40 }
 0x28b   : > { %2521 = vmatprep.subr.bf16.mxu0 %v1512_v33 }
 0x28c   : > { %2522 = vmatpush3.bf16.msra.mxu0 %v1512_v33 }
 0x28d   : > { %2523 = vmatprep.subr.bf16.mxu0 %v1513_v24 }
 0x290   : > { %2524 = vmatpush3.bf16.msra.mxu0 %v1513_v24 }
 0x291   : > { %2525 = vmatprep.subr.bf16.mxu0 %v1514_v14 }
 0x294   : > { %2526 = vmatpush3.bf16.msra.mxu0 %v1514_v14 }
 0x295   : > { %2527 = vmatprep.subr.bf16.mxu0 %v1515_v6 }
 0x298   : > { %2528 = vmatpush3.bf16.msra.mxu0 %v1515_v6 }
 0x2d1   : > { %v1528_v21 = vpop.trf.xlu0 }
 0x2d2   : > { %2529 = vmatprep.mubr.msk.bf16.mxu0 %vm1536_vm1, %v1528_v21 }
 0x2d5   : > { %v1529_v47 = vpop.trf.xlu0 }
 0x2d6   : > { %2530 = vmatmul.mubr.msk.bf16.vlgmr.msra.gmra.mrb[8].mxu0 %vm1536_vm1, %v1529_v47 }
 0x2e1   : > { %v1600_v41 = vpop.trf.xlu1 }
 0x2e2   : > { %2541 = vmatprep.mubr.msk.bf16.mxu1 %vm1536_vm1, %v1600_v41 }
 0x2e5   : > { %v1601_v37 = vpop.trf.xlu1 }
 0x2e6   : > { %2542 = vmatmul.mubr.msk.bf16.vlgmr.msra.gmra.mrb[24].mxu1 %vm1536_vm1, %v1601_v37 }
 0x3a9   : > { %v2531_v19 = vpop.f32.mrb[8].mxu0 }
 0x3aa   : > { %v1577_v2 = vpop.f32.mrb[9].mxu0  ;;  %v1672_v25 = vmul.f32 %v2531_v19, %v2374_v45 }
 0x3ab   : > { %v1670_v0 = vmul.f32 %v2374_v45, %v1577_v2  ;;  %v2532_v30 = vpop.f32.mrb[10].mxu0 }
 0x3ac   : > { %v1580_v23 = vpop.f32.mrb[11].mxu0  ;;  %v1673_v42 = vmul.f32 %v2532_v30, %v2374_v45  ;;  %v1684_v12 = vadd.f32 %v1680_v32, %v1672_v25 }
 0x3ad   : > { %v1671_v57 = vmul.f32 %v2374_v45, %v1580_v23  ;;  %v1682_v11 = vadd.f32 %v1678_v18, %v1670_v0 }
 0x3ae   : > { %v1685_v48 = vadd.f32 %v1681_v3, %v1673_v42  ;;  %v1696_v22 = vsel %vm536_vm0, %v1684_v12, -inf }
 0x3af   : > { %v1690_v7 = vsel %vm536_vm0, %v1682_v11, -inf  ;;  %v1683_v5 = vadd.f32 %v1679_v39, %v1671_v57 }
 0x3b0   : > { %1691 = vmax.xlane.f32.xlu0 %v1690_v7  ;;  %v1699_v20 = vsel %vm536_vm0, %v1685_v48, -inf }
 0x3b1   : > { %v1693_v59 = vsel %vm536_vm0, %v1683_v5, -inf }
 0x3b2   : > { %1694 = vmax.xlane.f32.xlu1 %v1693_v59 }
 0x3b4   : > { %1697 = vmax.xlane.f32.xlu0 %v1696_v22 }
 0x3b6   : > { %1700 = vmax.xlane.f32.xlu1 %v1699_v20 }
 0x3b9   : > { %v2543_v51 = vpop.f32.mrb[24].mxu1 }
 0x3ba   : > { %v1676_v49 = vmul.f32 %v2543_v51, %v2374_v45  ;;  %v1648_v26 = vpop.f32.mrb[25].mxu1 }
 0x3bb   : > { %v1674_v50 = vmul.f32 %v2374_v45, %v1648_v26  ;;  %v2544_v31 = vpop.f32.mrb[26].mxu1 }
 0x3bc   : > { %v1677_v43 = vmul.f32 %v2544_v31, %v2374_v45  ;;  %v1651_v54 = vpop.f32.mrb[27].mxu1  ;;  %v1688_v52 = vadd.f32 %v1680_v32, %v1676_v49 }
 0x3bd   : > { %v1675_v8 = vmul.f32 %v2374_v45, %v1651_v54  ;;  %v1686_v13 = vadd.f32 %v1678_v18, %v1674_v50 }
 0x3be   : > { %v1689_v17 = vadd.f32 %v1681_v3, %v1677_v43  ;;  %v1708_v58 = vsel %vm536_vm0, %v1688_v52, -inf }
 0x3bf   : > { %v1702_v35 = vsel %vm536_vm0, %v1686_v13, -inf  ;;  %v1687_v34 = vadd.f32 %v1679_v39, %v1675_v8 }
 0x3c0   : > { %1703 = vmax.xlane.f32.xlu0 %v1702_v35  ;;  %v1711_v33 = vsel %vm536_vm0, %v1689_v17, -inf }
 0x3c1   : > { %v1705_v46 = vsel %vm536_vm0, %v1687_v34, -inf }
 0x3c2   : > { %1706 = vmax.xlane.f32.xlu1 %v1705_v46 }
 0x3c4   : > { %1709 = vmax.xlane.f32.xlu0 %v1708_v58 }
 0x3c6   : > { %1712 = vmax.xlane.f32.xlu1 %v1711_v33 }
 0x43d   : > { %v1692_v38 = vpop.xlane.xlu0 %1691 }
 0x43e   : > { %v1714_v24 = vsub.f32 %v1682_v11, %v1692_v38 }
 0x43f   : > { %v1695_v62 = vpop.xlane.xlu1 %1694 }
 0x440   : > { %v1722_v14 = vmul.f32 1.442695, %v1714_v24  ;;  %v1715_v4 = vsub.f32 %v1683_v5, %v1695_v62 }
 0x441   : > { %v1698_v40 = vpop.xlane.xlu0 %1697 }
 0x442   : > { %2721 = vpow2.f32 %v1722_v14  ;;  %v1716_v6 = vsub.f32 %v1684_v12, %v1698_v40  ;;  %v1724_v37 = vmul.f32 1.442695, %v1715_v4 }
 0x443   : > { %v1701_v21 = vpop.xlane.xlu1 %1700 }
 0x444   : > { %v1726_v47 = vmul.f32 1.442695, %v1716_v6  ;;  %v1717_v41 = vsub.f32 %v1685_v48, %v1701_v21 }
 0x446   : > { %2723 = vpow2.f32 %v1726_v47  ;;  %v1728_v45 = vmul.f32 1.442695, %v1717_v41 }
 0x448   : > { %2725 = vpow2.f32 %v1728_v45 }
 0x449   : > { %2727 = vpow2.f32 %v1724_v37 }
 0x44c   : > { %v3616_v19 = vpop.eup %2721 }
 0x44d   : > { %v1704_v2 = vpop.xlane.xlu0 %1703  ;;  %v1738_v18 = vsel %vm536_vm0, %v3616_v19, 0.0 }
 0x44e   : > { %1739 = vadd.xlane.f32.xlu0 %v1738_v18  ;;  %v1718_v0 = vsub.f32 %v1686_v13, %v1704_v2 }
 0x44f   : > { %v1707_v22 = vpop.xlane.xlu1 %1706 }
 0x450   : > { %v3620_v25 = vpop.eup %2723  ;;  %v1730_v11 = vmul.f32 1.442695, %v1718_v0  ;;  %v1719_v49 = vsub.f32 %v1687_v34, %v1707_v22 }
 0x451   : > { %v1710_v30 = vpop.xlane.xlu0 %1709  ;;  %v1744_v23 = vsel %vm536_vm0, %v3620_v25, 0.0 }
 0x452   : > { %v3624_v39 = vpop.eup %2725  ;;  %v1720_v32 = vsub.f32 %v1688_v52, %v1710_v30  ;;  %1745 = vadd.xlane.f32.xlu0 %v1744_v23  ;;  %v1732_v50 = vmul.f32 1.442695, %v1719_v49 }
 0x453   : > { %v1747_v42 = vsel %vm536_vm0, %v3624_v39, 0.0  ;;  %v2728_v57 = vpop.eup %2727  ;;  %v1713_v20 = vpop.xlane.xlu1 %1712 }
 0x454   : > { %v1734_v3 = vmul.f32 1.442695, %v1720_v32  ;;  %1748 = vadd.xlane.f32.xlu1 %v1747_v42  ;;  %v1741_v7 = vsel %vm536_vm0, %v2728_v57, 0.0  ;;  %v1721_v51 = vsub.f32 %v1689_v17, %v1713_v20  ;;  %v2647_v42 = vld [vmem:[%s3774_s10] sm:$0xff]  }
 0x456   : > { %2729 = vpow2.f32 %v1734_v3  ;;  %v1736_v26 = vmul.f32 1.442695, %v1721_v51 }
 0x457   : > { %2731 = vpow2.f32 %v1730_v11 }
 0x458   : > { %1742 = vadd.xlane.f32.xlu1 %v1741_v7  ;;  %2733 = vpow2.f32 %v1736_v26 }
 0x459   : > { %2735 = vpow2.f32 %v1732_v50 }
 0x460   : > { %v3629_v5 = vpop.eup %2729 }
 0x461   : > { %v1756_v12 = vsel %vm536_vm0, %v3629_v5, 0.0  ;;  %v3633_v59 = vpop.eup %2731 }
 0x462   : > { %1757 = vadd.xlane.f32.xlu0 %v1756_v12  ;;  %v1750_v48 = vsel %vm536_vm0, %v3633_v59, 0.0 }
 0x466   : > { %1751 = vadd.xlane.f32.xlu0 %v1750_v48 }
 0x469   : > { %1788 = vrot.lane.b32.xlu1 %v3531_v53, %s2761_s25  ;;  %v3644_v53 = vpop.eup %2733 }
 0x46d   : > { %1790 = vrot.lane.b32.xlu1 %v3517_v29, %s2761_s25  ;;  %v1759_v29 = vsel %vm536_vm0, %v3644_v53, 0.0 }
 0x47c   : > { %1786 = vrot.lane.b32.xlu0 %v3520_v55, %s2761_s25  ;;  %v3649_v55 = vpop.eup %2735 }
 0x480   : > { %1794 = vrot.lane.b32.xlu0 %v3548_v1, %s2761_s25 }
 0x484   : > { %1798 = vrot.lane.b32.xlu0 %v3544_v16, %s2761_s25  ;;  %v1753_v16 = vsel %vm536_vm0, %v3649_v55, 0.0 }
 0x488   : > { %1943 = vrot.lane.b32.xlu0 %v3368_v44, %s2761_s25 }
 0x48c   : > { %1947 = vrot.lane.b32.xlu0 %v3365_v56, %s2761_s25 }
 0x490   : > { %1951 = vrot.lane.b32.xlu0 %v3391_v63, %s2761_s25 }
 0x491   : > { %1760 = vadd.xlane.f32.xlu1 %v1759_v29 }
 0x494   : > { %1955 = vrot.lane.b32.xlu0 %v3388_v61, %s2761_s25 }
 0x495   : > { %1754 = vadd.xlane.f32.xlu1 %v1753_v16 }
 0x4a6   : > { %1792 = vrot.lane.b32.xlu1 %v3524_v9, %s2761_s25 }
 0x4aa   : > { %1796 = vrot.lane.b32.xlu1 %v3559_v36, %s2761_s25 }
 0x4ae   : > { %1800 = vrot.lane.b32.xlu1 %v3553_v60, %s2761_s25 }
 0x4b2   : > { %1945 = vrot.lane.b32.xlu1 %v3376_v28, %s2761_s25 }
 0x4b6   : > { %1949 = vrot.lane.b32.xlu1 %v3373_v27, %s2761_s25 }
 0x4ba   : > { %1953 = vrot.lane.b32.xlu1 %v3400_v15, %s2761_s25 }
 0x4be   : > { %1957 = vrot.lane.b32.xlu1 %v3397_v10, %s2761_s25 }
 0x4db   : > { %v1740_v56 = vpop.xlane.xlu0 %1739 }
 0x4dc   : > { %2737 = vrcp.f32 %v1740_v56 }
 0x4df   : > { %v1746_v61 = vpop.xlane.xlu0 %1745 }
 0x4e1   : > { %v1749_v44 = vpop.xlane.xlu1 %1748 }
 0x4e2   : > { %2739 = vrcp.f32 %v1749_v44 }
 0x4e3   : > { %2741 = vrcp.f32 %v1746_v61 }
 0x4e5   : > { %v1743_v63 = vpop.xlane.xlu1 %1742 }
 0x4e6   : > { %2743 = vrcp.f32 %v1743_v63  ;;  %v2738_v9 = vpop.eup %2737 }
 0x4e7   : > { %v1770_v28 = vmul.f32 %v2738_v9, %v3616_v19 }
 0x4e9   : > { %v1789_v34 = vpop.permute.xlu1 %1788 }
 0x4ec   : > { %v2740_v1 = vpop.eup %2739 }
 0x4ed   : > { %v2742_v36 = vpop.eup %2741  ;;  %v1773_v15 = vmul.f32 %v2740_v1, %v3624_v39  ;;  %v1791_v58 = vpop.permute.xlu1 %1790 }
 0x4ee   : > { %v1772_v8 = vmul.f32 %v2742_v36, %v3620_v25 }
 0x4ef   : > { %v1758_v60 = vpop.xlane.xlu0 %1757 }
 0x4f0   : > { %v2744_v31 = vpop.eup %2743  ;;  %v2611_v13 = vpack.c.bf16 %v1773_v15, %v1772_v8 }
 0x4f1   : > { %v1771_v27 = vmul.f32 %v2744_v31, %v2728_v57  ;;  %v2648_v57 = vld [vmem:[%s3774_s10 + $0x8] sm:$0xff]  }
 0x4f3   : > { %v1752_v43 = vpop.xlane.xlu0 %1751  ;;  %v2605_v54 = vpack.c.bf16 %v1771_v27, %v1770_v28 }
 0x4f4   : > { %2745 = vrcp.f32 %v1752_v43 }
 0x4f5   : > { %2607 = vmatprep.subr.msk.bf16.mxu0 %vm3665_vm2, %v2605_v54 }
 0x4f6   : > { %2610 = vmatpush3.bf16.xpose.msk.msra.mxu0 %vm3665_vm2, %v2605_v54 }
 0x4f7   : > { %v1787_v52 = vpop.permute.xlu0 %1786  ;;  %2613 = vmatprep.subr.msk.bf16.mxu0 %vm3665_vm2, %v2611_v13 }
 0x4f8   : > { %2553 = vmatprep.mubr.msk.f32.mxu0 %vm536_vm0, %v1787_v52 }
 0x4fb   : > { %v1795_v35 = vpop.permute.xlu0 %1794 }
 0x4fe   : > { %2616 = vmatpush3.bf16.xpose.msk.msra.mxu0 %vm3665_vm2, %v2611_v13  ;;  %v2746_v62 = vpop.eup %2745 }
 0x4ff   : > { %v1799_v17 = vpop.permute.xlu0 %1798  ;;  %v1774_v47 = vmul.f32 %v2746_v62, %v3633_v59  ;;  %2585 = vmatprep.subr.bf16.mxu0 %v2647_v42 }
 0x503   : > { %v1944_v46 = vpop.permute.xlu0 %1943 }
 0x504   : > { %2573 = vmatprep.mubr.msk.f32.mxu1 %vm536_vm0, %v1944_v46 }
 0x505   : > { %2554 = vmatmul.mubr.msk.f32.vlgmr.msra.gmra.mrb[12].mxu0 %vm536_vm0, %v1789_v34 }
 0x506   : > { %2556 = vmatprep.mubr.msk.f32.mxu0 %vm536_vm0, %v1791_v58  ;;  %2586 = vmatpush3.bf16.msra.mxu0 %v2647_v42 }
 0x507   : > { %v1948_v25 = vpop.permute.xlu0 %1947  ;;  %2587 = vmatprep.subr.bf16.mxu0 %v2648_v57 }
 0x50a   : > { %2588 = vmatpush3.bf16.msra.mxu0 %v2648_v57 }
 0x50b   : > { %v1952_v30 = vpop.permute.xlu0 %1951 }
 0x50f   : > { %v1956_v39 = vpop.permute.xlu0 %1955 }
 0x51e   : > { %v1761_v33 = vpop.xlane.xlu1 %1760 }
 0x51f   : > { %2747 = vrcp.f32 %v1761_v33 }
 0x520   : > { %2749 = vrcp.f32 %v1758_v60  ;;  %v2399_v60 = vld [vmem:[%s3775_s11] ss:$0 sm:$0xff] }
 0x522   : > { %v1755_v38 = vpop.xlane.xlu1 %1754 }
 0x523   : > { %2751 = vrcp.f32 %v1755_v38 }
 0x526   : > { %v1793_v24 = vpop.permute.xlu1 %1792 }
 0x527   : > { %2557 = vmatmul.mubr.msk.f32.gmra.mrb[14].mxu0 %vm536_vm0, %v1793_v24 }
 0x528   : > { %2559 = vmatprep.mubr.msk.f32.mxu0 %vm536_vm0, %v1795_v35 }
 0x529   : > { %v2748_v40 = vpop.eup %2747 }
 0x52a   : > { %v1797_v14 = vpop.permute.xlu1 %1796  ;;  %v2750_v4 = vpop.eup %2749  ;;  %v1777_v37 = vmul.f32 %v2748_v40, %v3644_v53 }
 0x52b   : > { %2560 = vmatmul.mubr.msk.f32.gmra.mrb[16].mxu0 %vm536_vm0, %v1797_v14  ;;  %v1776_v19 = vmul.f32 %v2750_v4, %v3629_v5 }
 0x52c   : > { %2562 = vmatprep.mubr.msk.f32.mxu0 %vm536_vm0, %v1799_v17 }
 0x52d   : > { %v2752_v6 = vpop.eup %2751  ;;  %v2623_v2 = vpack.c.bf16 %v1777_v37, %v1776_v19 }
 0x52e   : > { %v1801_v21 = vpop.permute.xlu1 %1800  ;;  %v1775_v41 = vmul.f32 %v2752_v6, %v3649_v55 }
 0x52f   : > { %2563 = vmatmul.mubr.msk.f32.gmra.mrb[18].mxu0 %vm536_vm0, %v1801_v21 }
 0x530   : > { %v2617_v45 = vpack.c.bf16 %v1775_v41, %v1774_v47 }
 0x532   : > { %2619 = vmatprep.subr.msk.bf16.mxu1 %vm3665_vm2, %v2617_v45  ;;  %v1946_v18 = vpop.permute.xlu1 %1945 }
 0x533   : > { %2622 = vmatpush3.bf16.xpose.msk.msra.mxu1 %vm3665_vm2, %v2617_v45 }
 0x534   : > { %2625 = vmatprep.subr.msk.bf16.mxu1 %vm3665_vm2, %v2623_v2 }
 0x536   : > { %v1950_v0 = vpop.permute.xlu1 %1949 }
 0x53a   : > { %v1954_v23 = vpop.permute.xlu1 %1953 }
 0x53b   : > { %2628 = vmatpush3.bf16.xpose.msk.msra.mxu1 %vm3665_vm2, %v2623_v2 }
 0x53e   : > { %v1958_v32 = vpop.permute.xlu1 %1957 }
 0x542   : > { %2574 = vmatmul.mubr.msk.f32.vlgmr.msra.gmra.mrb[28].mxu1 %vm536_vm0, %v1946_v18 }
 0x543   : > { %2576 = vmatprep.mubr.msk.f32.mxu1 %vm536_vm0, %v1948_v25 }
 0x546   : > { %2577 = vmatmul.mubr.msk.f32.gmra.mrb[30].mxu1 %vm536_vm0, %v1950_v0 }
 0x547   : > { %2579 = vmatprep.mubr.msk.f32.mxu1 %vm536_vm0, %v1952_v30 }
 0x54a   : > { %2580 = vmatmul.mubr.msk.f32.gmra.mrb[32].mxu1 %vm536_vm0, %v1954_v23 }
 0x54b   : > { %2582 = vmatprep.mubr.msk.f32.mxu1 %vm536_vm0, %v1956_v39 }
 0x54e   : > { %2583 = vmatmul.mubr.msk.f32.gmra.mrb[34].mxu1 %vm536_vm0, %v1958_v32 }
 0x5d8   : > { %v2555_v11 = vpop.f32.mrb[12].mxu0 }
 0x5d9   : > { %v1896_v3 = vpop.f32.mrb[13].mxu0 }
 0x5da   : > { %v2092_v7 = vpack.c.bf16 %v2555_v11, %v1896_v3 }
 0x5dc   : > { %2589 = vmatprep.mubr.msk.bf16.mxu0 %vm536_vm0, %v2092_v7 }
 0x5fa   : > { %v2558_v5 = vpop.f32.mrb[14].mxu0 }
 0x5fb   : > { %v1906_v12 = vpop.f32.mrb[15].mxu0 }
 0x5fc   : > { %v2093_v59 = vpack.c.bf16 %v2558_v5, %v1906_v12 }
 0x5fe   : > { %v2561_v48 = vpop.f32.mrb[16].mxu0  ;;  %2590 = vmatmul.mubr.msk.bf16.vlgmr.msra.gmra.mrb[20].mxu0 %vm536_vm0, %v2093_v59 }
 0x5ff   : > { %v1916_v22 = vpop.f32.mrb[17].mxu0 }
 0x600   : > { %v2094_v20 = vpack.c.bf16 %v2561_v48, %v1916_v22 }
 0x602   : > { %v2564_v51 = vpop.f32.mrb[18].mxu0  ;;  %2593 = vmatprep.mubr.msk.bf16.mxu0 %vm536_vm0, %v2094_v20 }
 0x603   : > { %v1926_v49 = vpop.f32.mrb[19].mxu0 }
 0x604   : > { %v2095_v26 = vpack.c.bf16 %v2564_v51, %v1926_v49 }
 0x606   : > { %2594 = vmatmul.mubr.msk.bf16.gmra.mrb[24].mxu0 %vm536_vm0, %v2095_v26 }
 0x615   : > { %v2575_v50 = vpop.f32.mrb[28].mxu1 }
 0x616   : > { %v2053_v53 = vpop.f32.mrb[29].mxu1 }
 0x617   : > { %v2096_v29 = vpack.c.bf16 %v2575_v50, %v2053_v53 }
 0x619   : > { %v2578_v55 = vpop.f32.mrb[30].mxu1  ;;  %2597 = vmatprep.mubr.msk.bf16.mxu0 %vm536_vm0, %v2096_v29 }
 0x61a   : > { %v2063_v16 = vpop.f32.mrb[31].mxu1 }
 0x61b   : > { %v2097_v56 = vpack.c.bf16 %v2578_v55, %v2063_v16 }
 0x61d   : > { %v2581_v44 = vpop.f32.mrb[32].mxu1  ;;  %2598 = vmatmul.mubr.msk.bf16.gmra.mrb[28].mxu0 %vm536_vm0, %v2097_v56 }
 0x61e   : > { %v2073_v61 = vpop.f32.mrb[33].mxu1 }
 0x61f   : > { %v2098_v63 = vpack.c.bf16 %v2581_v44, %v2073_v61 }
 0x621   : > { %v2584_v9 = vpop.f32.mrb[34].mxu1  ;;  %2601 = vmatprep.mubr.msk.bf16.mxu0 %vm536_vm0, %v2098_v63 }
 0x622   : > { %v2083_v1 = vpop.f32.mrb[35].mxu1 }
 0x623   : > { %v2099_v36 = vpack.c.bf16 %v2584_v9, %v2083_v1 }
 0x625   : > { %2602 = vmatmul.mubr.msk.bf16.gmra.mrb[32].mxu0 %vm536_vm0, %v2099_v36 }
 0x6d1   : > { %v2591_v31 = vpop.f32.mrb[20].mxu0 }
 0x6d2   : > { %v2190_v28 = vadd.f32 %v2591_v31, %v2399_v60  ;;  %v2181_v27 = vpop.f32.mrb[21].mxu0 }
 0x6d3   : > { %v2182_v15 = vadd.f32 %v2399_v60, %v2181_v27  ;;  %v2592_v10 = vpop.f32.mrb[22].mxu0 }
 0x6d4   : > { %2246 = vst.msk [vmem:[%s3727_s20 + $0x10] sm:$0xff] %vm536_vm0, %v2190_v28  ;;  %v2193_v43 = vadd.f32 %v2592_v10, %v2399_v60  ;;  %v2184_v54 = vpop.f32.mrb[23].mxu0 }
 0x6d5   : > { %2244 = vst.msk [vmem:[%s3727_s20] sm:$0xff] %vm536_vm0, %v2182_v15  ;;  %v2185_v8 = vadd.f32 %v2399_v60, %v2184_v54 }
 0x6d6   : > { %2247 = vst.msk [vmem:[%s3727_s20 + $0x18] sm:$0xff] %vm536_vm0, %v2193_v43 }
 0x6d7   : > { %2245 = vst.msk [vmem:[%s3727_s20 + $0x8] sm:$0xff] %vm536_vm0, %v2185_v8 }
 0x6d9   : > { %v2595_v13 = vpop.f32.mrb[24].mxu0 }
 0x6da   : > { %v2206_v52 = vadd.f32 %v2595_v13, %v2399_v60  ;;  %v2197_v35 = vpop.f32.mrb[25].mxu0 }
 0x6db   : > { %v2198_v34 = vadd.f32 %v2399_v60, %v2197_v35  ;;  %v2596_v17 = vpop.f32.mrb[26].mxu0 }
 0x6dc   : > { %2250 = vst.msk [vmem:[%s3727_s20 + $0x30] sm:$0xff] %vm536_vm0, %v2206_v52  ;;  %v2209_v46 = vadd.f32 %v2596_v17, %v2399_v60  ;;  %v2200_v58 = vpop.f32.mrb[27].mxu0 }
 0x6dd   : > { %2248 = vst.msk [vmem:[%s3727_s20 + $0x20] sm:$0xff] %vm536_vm0, %v2198_v34  ;;  %v2201_v33 = vadd.f32 %v2399_v60, %v2200_v58 }
 0x6de   : > { %2251 = vst.msk [vmem:[%s3727_s20 + $0x38] sm:$0xff] %vm536_vm0, %v2209_v46 }
 0x6df   : > { %2249 = vst.msk [vmem:[%s3727_s20 + $0x28] sm:$0xff] %vm536_vm0, %v2201_v33 }
 0x6f0   : > { %v2599_v38 = vpop.f32.mrb[28].mxu0 }
 0x6f1   : > { %v2222_v24 = vadd.f32 %v2599_v38, %v2399_v60  ;;  %v2213_v62 = vpop.f32.mrb[29].mxu0 }
 0x6f2   : > { %v2214_v14 = vadd.f32 %v2399_v60, %v2213_v62  ;;  %v2600_v40 = vpop.f32.mrb[30].mxu0 }
 0x6f3   : > { %2254 = vst.msk [vmem:[%s3727_s20 + $0x50] sm:$0xff] %vm536_vm0, %v2222_v24  ;;  %v2225_v4 = vadd.f32 %v2600_v40, %v2399_v60  ;;  %v2216_v6 = vpop.f32.mrb[31].mxu0 }
 0x6f4   : > { %2252 = vst.msk [vmem:[%s3727_s20 + $0x40] sm:$0xff] %vm536_vm0, %v2214_v14  ;;  %v2217_v21 = vadd.f32 %v2399_v60, %v2216_v6 }
 0x6f5   : > { %2255 = vst.msk [vmem:[%s3727_s20 + $0x58] sm:$0xff] %vm536_vm0, %v2225_v4 }
 0x6f6   : > { %2253 = vst.msk [vmem:[%s3727_s20 + $0x48] sm:$0xff] %vm536_vm0, %v2217_v21 }
 0x6f8   : > { %v2603_v47 = vpop.f32.mrb[32].mxu0 }
 0x6f9   : > { %v2238_v41 = vadd.f32 %v2603_v47, %v2399_v60  ;;  %v2229_v37 = vpop.f32.mrb[33].mxu0 }
 0x6fa   : > { %v2230_v45 = vadd.f32 %v2399_v60, %v2229_v37  ;;  %v2604_v19 = vpop.f32.mrb[34].mxu0 }
 0x6fb   : > { %2258 = vst.msk [vmem:[%s3727_s20 + $0x70] sm:$0xff] %vm536_vm0, %v2238_v41  ;;  %v2241_v2 = vadd.f32 %v2604_v19, %v2399_v60  ;;  %v2232_v18 = vpop.f32.mrb[35].mxu0 }
 0x6fc   : > { %2256 = vst.msk [vmem:[%s3727_s20 + $0x60] sm:$0xff] %vm536_vm0, %v2230_v45  ;;  %v2233_v25 = vadd.f32 %v2399_v60, %v2232_v18 }
 0x6fd   : > { %2259 = vst.msk [vmem:[%s3727_s20 + $0x78] sm:$0xff] %vm536_vm0, %v2241_v2 }
 0x6fe   : > { %2257 = vst.msk [vmem:[%s3727_s20 + $0x68] sm:$0xff] %vm536_vm0, %v2233_v25 }
 0x6ff PF: > { %s24_s29 = sadd.s32 1, %s2759_s29  }
 0x700   : > { %p21_p4 = scmp.ge.s32.totalorder %s24_s29, 10  }
 0x702   :  { %23 = sbr.rel (!%p21_p4) target bundleno = 1 (0x1), region = 109 }

</bundles_post_ra>
